<compile_context>
chip_gen: v7x
topology: tpu7x:2x2x1
jax: 0.10.0
libtpu: 0.0.40
codegen_flags: <defaults>
</compile_context>

<pallas_src>
import functools
import math

import jax
import jax.numpy as jnp
from jax.experimental import pallas as pl
from jax.experimental.pallas import tpu as pltpu

LN_EPS = 1e-5  # PyTorch nn.LayerNorm default


# ------------------------------ kernel helpers ------------------------------ #
def _layernorm(y, g, b):
    mu = jnp.mean(y, axis=-1, keepdims=True)
    var = jnp.mean(jnp.square(y - mu), axis=-1, keepdims=True)
    return (y - mu) * jax.lax.rsqrt(var + LN_EPS) * g + b


# --------------------------- fused SA-EEND kernel --------------------------- #
def _sa_eend_kernel(x_ref, cvec_ref, w_in_ref, wqkv_ref, wo_ref, wf1_ref,
                    wf2_ref, lvec_ref, w_cls_ref, o_ref, h_ref,
                    *, nhead, bn, T):
    l = pl.program_id(1)
    D = h_ref.shape[1]
    F = wf1_ref.shape[1]
    dh = D // nhead
    scale = 1.0 / math.sqrt(dh)

    # ---- fused input projection + LayerNorm (first layer step only) ---- #
    @pl.when(l == 0)
    def _input_proj():
        xb = x_ref[...].astype(jnp.bfloat16)
        y = jnp.dot(xb, w_in_ref[...], preferred_element_type=jnp.float32)
        y = y + cvec_ref[0:1, :D]
        h_ref[...] = _layernorm(y, cvec_ref[1:2, :D], cvec_ref[2:3, :D])

    h = h_ref[...]                               # (R, D) f32, VMEM-resident
    R = h.shape[0]

    # ---- fused Q/K/V projection: one (R,D)@(D,3D) bf16 MXU op ---- #
    qkv = jnp.dot(h.astype(jnp.bfloat16), wqkv_ref[...],
                  preferred_element_type=jnp.float32) + lvec_ref[0:1, :3 * D]
    q, k, v = qkv[:, 0:D], qkv[:, D:2 * D], qkv[:, 2 * D:3 * D]

    # ---- per-head attention, batched over the bn sequences in this block ---- #
    heads = []
    for hd in range(nhead):
        sl = slice(hd * dh, (hd + 1) * dh)
        qh = q[:, sl].reshape(bn, T, dh).astype(jnp.bfloat16)
        kh = k[:, sl].reshape(bn, T, dh).astype(jnp.bfloat16)
        vh = v[:, sl].reshape(bn, T, dh).astype(jnp.bfloat16)
        s = jnp.einsum("bqd,bkd->bqk", qh, kh,
                       preferred_element_type=jnp.float32) * scale
        s = s - jnp.max(s, axis=-1, keepdims=True)
        e = jnp.exp(s)
        p = e / jnp.sum(e, axis=-1, keepdims=True)        # exact divide (see review)
        heads.append(jnp.einsum("bqk,bkd->bqd", p.astype(jnp.bfloat16), vh,
                                preferred_element_type=jnp.float32))
    ctx = jnp.concatenate(heads, axis=-1).reshape(R, D)

    attn = jnp.dot(ctx.astype(jnp.bfloat16), wo_ref[...],
                   preferred_element_type=jnp.float32) + lvec_ref[1:2, :D]

    # ---- post-norm residual blocks (dropout == identity in eval mode) ---- #
    y1 = _layernorm(h + attn, lvec_ref[2:3, :D], lvec_ref[3:4, :D])
    hid = jax.nn.relu(
        jnp.dot(y1.astype(jnp.bfloat16), wf1_ref[...],
                preferred_element_type=jnp.float32) + lvec_ref[4:5, :F])
    ff = jnp.dot(hid.astype(jnp.bfloat16), wf2_ref[...],
                 preferred_element_type=jnp.float32) + lvec_ref[5:6, :D]
    y2 = _layernorm(y1 + ff, lvec_ref[6:7, :D], lvec_ref[7:8, :D])
    h_ref[...] = y2                              # stays resident across layer steps

    # ---- fused classifier (last layer step only) ---- #
    @pl.when(l == pl.num_programs(1) - 1)
    def _classifier():
        s_pad = o_ref.shape[1]
        logits = jnp.dot(y2.astype(jnp.bfloat16), w_cls_ref[...],
                         preferred_element_type=jnp.float32) + cvec_ref[3:4, :s_pad]
        o_ref[...] = logits.astype(o_ref.dtype)


# -------------------------------- wrapper ----------------------------------- #
def _round_up(v, m):
    return (v + m - 1) // m * m


def _pad_to(a, shape):
    pads = [(0, s - d) for d, s in zip(a.shape, shape)]
    return jnp.pad(a, pads) if any(p[1] for p in pads) else a


def _pick_bn(N, T):
    # Largest divisor of N whose bn*T-row activation block stays modest; this
    # amortizes per-layer weight streaming over bn sequences.
    bn = 1
    for cand in range(1, N + 1):
        if N % cand == 0 and cand * T <= 1024:
            bn = cand
    return bn


def sa_eend_forward(x, P, nhead, weight_dtype=jnp.bfloat16):
    N, T, Din = x.shape
    D = P["w_in"].shape[1]
    F = P["layers"][0]["wf1"].shape[1]
    S = P["w_cls"].shape[1]
    L = len(P["layers"])

    Din_pad = _round_up(Din, 128)
    S_pad = _round_up(S, 128)
    CW = max(D, S_pad)           # width of packed constant vectors
    LW = max(3 * D, F)           # width of packed per-layer vectors

    bn = _pick_bn(N, T)
    NB = N // bn
    R = bn * T
    M = N * T

    # ---- host-side packing / padding / bf16 casts (outside the kernel) ---- #
    x_flat = _pad_to(x.reshape(M, Din), (M, Din_pad))
    w_in = _pad_to(P["w_in"], (Din_pad, D)).astype(weight_dtype)
    w_cls = _pad_to(P["w_cls"], (D, S_pad)).astype(weight_dtype)

    cvec = jnp.concatenate([
        _pad_to(P["b_in"], (1, CW)),
        _pad_to(P["g_in"], (1, CW)),
        _pad_to(P["beta_in"], (1, CW)),
        _pad_to(P["b_cls"], (1, CW)),
    ], axis=0)                                                    # (4, CW) f32

    layers = P["layers"]
    wqkv = jnp.stack([jnp.concatenate([lp["wq"], lp["wk"], lp["wv"]], axis=1)
                      for lp in layers]).astype(weight_dtype)     # (L, D, 3D)
    wo = jnp.stack([lp["wo"] for lp in layers]).astype(weight_dtype)   # (L, D, D)
    wf1 = jnp.stack([lp["wf1"] for lp in layers]).astype(weight_dtype)  # (L, D, F)
    wf2 = jnp.stack([lp["wf2"] for lp in layers]).astype(weight_dtype)  # (L, F, D)

    def pack_layer_vecs(lp):
        rows = [jnp.concatenate([lp["bq"], lp["bk"], lp["bv"]], axis=1),
                lp["bo"], lp["g1"], lp["beta1"],
                lp["bf1"], lp["bf2"], lp["g2"], lp["beta2"]]
        return jnp.concatenate([_pad_to(r, (1, LW)) for r in rows], axis=0)
    lvec = jnp.stack([pack_layer_vecs(lp) for lp in layers])      # (L, 8, LW) f32

    kernel = functools.partial(_sa_eend_kernel, nhead=nhead, bn=bn, T=T)

    def act_spec(width):
        return pl.BlockSpec((R, width), lambda nb, l: (nb, 0))

    def const_spec(shape):
        nd = len(shape)
        return pl.BlockSpec(shape, lambda nb, l, _nd=nd: (0,) * _nd)

    def layer_spec(*dims):
        return pl.BlockSpec((pl.Squeezed(),) + dims, lambda nb, l: (l, 0, 0))

    out_flat = pl.pallas_call(
        kernel,
        out_shape=jax.ShapeDtypeStruct((M, S_pad), x.dtype),
        grid=(NB, L),
        in_specs=[act_spec(Din_pad),            # x (read once per nb block)
                  const_spec((4, CW)),          # packed b_in/g_in/beta_in/b_cls
                  const_spec((Din_pad, D)),     # w_in (bf16)
                  layer_spec(D, 3 * D),         # Wqkv (bf16)
                  layer_spec(D, D),             # Wo (bf16)
                  layer_spec(D, F),             # FFN W1 (bf16)
                  layer_spec(F, D),             # FFN W2 (bf16)
                  layer_spec(8, LW),            # packed per-layer biases/LN params
                  const_spec((D, S_pad))],      # classifier weight (bf16)
        out_specs=act_spec(S_pad),
        scratch_shapes=[pltpu.VMEM((R, D), jnp.float32)],   # resident activation
        compiler_params=pltpu.CompilerParams(
            dimension_semantics=("parallel", "arbitrary"),
            vmem_limit_bytes=48 * 1024 * 1024),
    )(x_flat, cvec, w_in, wqkv, wo, wf1, wf2, lvec, w_cls)

    return out_flat[:, :S].reshape(N, T, S)


# --------------------------- pure-JAX reference ----------------------------- #
def _ref_ln(y, g, b):
    mu = y.mean(-1, keepdims=True)
    var = ((y - mu) ** 2).mean(-1, keepdims=True)
    return (y - mu) / jnp.sqrt(var + LN_EPS) * g + b


def reference_forward(x, P, nhead):
    y = _ref_ln(x @ P["w_in"] + P["b_in"], P["g_in"], P["beta_in"])
    N, T, D = y.shape
    dh = D // nhead
    for lp in P["layers"]:
        q = (y @ lp["wq"] + lp["bq"]).reshape(N, T, nhead, dh)
        k = (y @ lp["wk"] + lp["bk"]).reshape(N, T, nhead, dh)
        v = (y @ lp["wv"] + lp["bv"]).reshape(N, T, nhead, dh)
        s = jnp.einsum("nthd,nshd->nhts", q, k) / math.sqrt(dh)
        p = jax.nn.softmax(s, axis=-1)
        ctx = jnp.einsum("nhts,nshd->nthd", p, v).reshape(N, T, D)
        attn = ctx @ lp["wo"] + lp["bo"]
        y1 = _ref_ln(y + attn, lp["g1"], lp["beta1"])
        ff = jax.nn.relu(y1 @ lp["wf1"] + lp["bf1"]) @ lp["wf2"] + lp["bf2"]
        y = _ref_ln(y1 + ff, lp["g2"], lp["beta2"])
    return y @ P["w_cls"] + P["b_cls"]


# --------------------------------- params ----------------------------------- #
def init_params(key, input_dim, d_model, nhead, dim_ffn, num_layers, n_speakers):
    def dense(k, din, dout):
        lim = 1.0 / math.sqrt(din)
        w = jax.random.uniform(k, (din, dout), jnp.float32, -lim, lim)
        b = jnp.zeros((1, dout), jnp.float32)
        return w, b

    keys = jax.random.split(key, 2 + num_layers)
    w_in, b_in = dense(keys[0], input_dim, d_model)
    w_cls, b_cls = dense(keys[1], d_model, n_speakers)
    P = {
        "w_in": w_in, "b_in": b_in,
        "g_in": jnp.ones((1, d_model), jnp.float32),
        "beta_in": jnp.zeros((1, d_model), jnp.float32),
        "w_cls": w_cls, "b_cls": b_cls,
        "layers": [],
    }
    for li in range(num_layers):
        lk = jax.random.split(keys[2 + li], 6)
        wq, bq = dense(lk[0], d_model, d_model)
        wk, bk = dense(lk[1], d_model, d_model)
        wv, bv = dense(lk[2], d_model, d_model)
        wo, bo = dense(lk[3], d_model, d_model)
        wf1, bf1 = dense(lk[4], d_model, dim_ffn)
        wf2, bf2 = dense(lk[5], dim_ffn, d_model)
        P["layers"].append({
            "wq": wq, "bq": bq, "wk": wk, "bk": bk, "wv": wv, "bv": bv,
            "wo": wo, "bo": bo,
            "g1": jnp.ones((1, d_model), jnp.float32),
            "beta1": jnp.zeros((1, d_model), jnp.float32),
            "wf1": wf1, "bf1": bf1, "wf2": wf2, "bf2": bf2,
            "g2": jnp.ones((1, d_model), jnp.float32),
            "beta2": jnp.zeros((1, d_model), jnp.float32),
        })
    return P


# ---------------------------------- main ------------------------------------ #
if __name__ == "__main__":
    # Small SA-EEND config.
    N, T = 2, 16
    input_dim, d_model, nhead = 64, 128, 4
    dim_ffn, num_layers, n_speakers = 256, 2, 3

    key = jax.random.PRNGKey(0)
    kx, kp = jax.random.split(key)
    X = jax.random.normal(kx, (N, T, input_dim), jnp.float32)
    P = init_params(kp, input_dim, d_model, nhead, dim_ffn, num_layers, n_speakers)

    out = sa_eend_forward(X, P, nhead)
    out = jax.block_until_ready(out)

    ref = reference_forward(X, P, nhead)
    assert out.shape == (N, T, n_speakers), out.shape
    assert bool(jnp.all(jnp.isfinite(out)))
    # bf16 weight streaming trades ~1e-2-level error for ~2x HBM bandwidth;
    # tolerance is set accordingly (reference is full f32).
    assert bool(jnp.allclose(out, ref, atol=5e-2, rtol=5e-2)), (
        float(jnp.max(jnp.abs(out - ref))))

    print("KERNEL_OK")
</pallas_src>

<mosaic_0001>
module attributes {stable_mosaic.version = 11 : i64} {
  func.func @_sa_eend_kernel(%arg0: i32, %arg1: i32, %arg2: memref<32x128xf32, #tpu.memory_space<vmem>>, %arg3: memref<4x128xf32, #tpu.memory_space<vmem>>, %arg4: memref<128x128xbf16, #tpu.memory_space<vmem>>, %arg5: memref<1x128x384xbf16, #tpu.memory_space<vmem>>, %arg6: memref<1x128x128xbf16, #tpu.memory_space<vmem>>, %arg7: memref<1x128x256xbf16, #tpu.memory_space<vmem>>, %arg8: memref<1x256x128xbf16, #tpu.memory_space<vmem>>, %arg9: memref<1x8x384xf32, #tpu.memory_space<vmem>>, %arg10: memref<128x128xbf16, #tpu.memory_space<vmem>>, %arg11: memref<32x128xf32, #tpu.memory_space<vmem>>, %arg12: memref<32x128xf32, #tpu.memory_space<vmem>>) attributes {dimension_semantics = [#tpu.dimension_semantics<parallel>, #tpu.dimension_semantics<arbitrary>], iteration_bounds = array<i64: 1, 2>, scalar_prefetch = 0 : i64, scratch_operands = 1 : i64, tpu.core_type = #tpu.core_type<tc>, window_params = [{transform_indices = @transform_0, window_bounds = array<i64: 32, 128>}, {pipeline_mode = #tpu.pipeline_mode<synchronous>, transform_indices = @transform_1, window_bounds = array<i64: 4, 128>}, {pipeline_mode = #tpu.pipeline_mode<synchronous>, transform_indices = @transform_2, window_bounds = array<i64: 128, 128>}, {transform_indices = @transform_3, window_bounds = array<i64: 1, 128, 384>}, {transform_indices = @transform_4, window_bounds = array<i64: 1, 128, 128>}, {transform_indices = @transform_5, window_bounds = array<i64: 1, 128, 256>}, {transform_indices = @transform_6, window_bounds = array<i64: 1, 256, 128>}, {transform_indices = @transform_7, window_bounds = array<i64: 1, 8, 384>}, {pipeline_mode = #tpu.pipeline_mode<synchronous>, transform_indices = @transform_8, window_bounds = array<i64: 128, 128>}, {transform_indices = @transform_9, window_bounds = array<i64: 32, 128>}]} {
    %c0_i32 = arith.constant 0 : i32
    %0 = arith.cmpi eq, %arg1, %c0_i32 : i32
    %1 = arith.extui %0 : i1 to i32
    %c0_i32_0 = arith.constant 0 : i32
    %2 = arith.cmpi ne, %1, %c0_i32_0 : i32
    scf.if %2 {
      %c0_68 = arith.constant 0 : index
      %c0_69 = arith.constant 0 : index
      %193 = vector.load %arg2[%c0_68, %c0_69] : memref<32x128xf32, #tpu.memory_space<vmem>>, vector<32x128xf32>
      %194 = arith.truncf %193 : vector<32x128xf32> to vector<32x128xbf16>
      %c0_70 = arith.constant 0 : index
      %c0_71 = arith.constant 0 : index
      %195 = vector.load %arg4[%c0_70, %c0_71] : memref<128x128xbf16, #tpu.memory_space<vmem>>, vector<128x128xbf16>
      %cst_72 = arith.constant dense<0.000000e+00> : vector<32x128xf32>
      %196 = tpu.matmul %194, %195, %cst_72 {dimension_numbers = #tpu.dot_dimension_numbers<[1], [0], [0], [1], [0, 0, 1, 1], [], []>} : vector<32x128xbf16>, vector<128x128xbf16>, vector<32x128xf32> -> vector<32x128xf32>
      %c0_73 = arith.constant 0 : index
      %c0_74 = arith.constant 0 : index
      %197 = vector.load %arg3[%c0_73, %c0_74] : memref<4x128xf32, #tpu.memory_space<vmem>>, vector<1x128xf32>
      %198 = vector.broadcast %197 : vector<1x128xf32> to vector<32x128xf32>
      %199 = arith.addf %196, %198 : vector<32x128xf32>
      %c1_75 = arith.constant 1 : index
      %c0_76 = arith.constant 0 : index
      %200 = vector.load %arg3[%c1_75, %c0_76] : memref<4x128xf32, #tpu.memory_space<vmem>>, vector<1x128xf32>
      %c2_77 = arith.constant 2 : index
      %c0_78 = arith.constant 0 : index
      %201 = vector.load %arg3[%c2_77, %c0_78] : memref<4x128xf32, #tpu.memory_space<vmem>>, vector<1x128xf32>
      %cst_79 = arith.constant dense<0.000000e+00> : vector<32xf32>
      %202 = vector.multi_reduction <add>, %199, %cst_79 [1] : vector<32x128xf32> to vector<32xf32>
      %203 = vector.shape_cast %202 : vector<32xf32> to vector<32x1xf32>
      %cst_80 = arith.constant 1.280000e+02 : f32
      %204 = vector.broadcast %cst_80 : f32 to vector<32x1xf32>
      %205 = arith.divf %203, %204 : vector<32x1xf32>
      %206 = vector.broadcast %205 : vector<32x1xf32> to vector<32x128xf32>
      %207 = arith.subf %199, %206 : vector<32x128xf32>
      %208 = arith.mulf %207, %207 : vector<32x128xf32>
      %cst_81 = arith.constant dense<0.000000e+00> : vector<32xf32>
      %209 = vector.multi_reduction <add>, %208, %cst_81 [1] : vector<32x128xf32> to vector<32xf32>
      %210 = vector.shape_cast %209 : vector<32xf32> to vector<32x1xf32>
      %cst_82 = arith.constant 1.280000e+02 : f32
      %211 = vector.broadcast %cst_82 : f32 to vector<32x1xf32>
      %212 = arith.divf %210, %211 : vector<32x1xf32>
      %213 = vector.broadcast %205 : vector<32x1xf32> to vector<32x128xf32>
      %214 = arith.subf %199, %213 : vector<32x128xf32>
      %cst_83 = arith.constant 9.99999974E-6 : f32
      %215 = vector.broadcast %cst_83 : f32 to vector<32x1xf32>
      %216 = arith.addf %212, %215 : vector<32x1xf32>
      %217 = math.rsqrt %216 : vector<32x1xf32>
      %218 = vector.broadcast %217 : vector<32x1xf32> to vector<32x128xf32>
      %219 = arith.mulf %214, %218 : vector<32x128xf32>
      %220 = vector.broadcast %200 : vector<1x128xf32> to vector<32x128xf32>
      %221 = arith.mulf %219, %220 : vector<32x128xf32>
      %222 = vector.broadcast %201 : vector<1x128xf32> to vector<32x128xf32>
      %223 = arith.addf %221, %222 : vector<32x128xf32>
      %c0_84 = arith.constant 0 : index
      %c0_85 = arith.constant 0 : index
      %224 = vector.load %arg12[%c0_84, %c0_85] : memref<32x128xf32, #tpu.memory_space<vmem>>, vector<32x128xf32>
      tpu.vector_store %arg12[%c0_84, %c0_85], %223 {strides = array<i32>} : memref<32x128xf32, #tpu.memory_space<vmem>>, vector<32x128xf32>,
    } else {
    }
    %c0 = arith.constant 0 : index
    %c0_1 = arith.constant 0 : index
    %3 = vector.load %arg12[%c0, %c0_1] : memref<32x128xf32, #tpu.memory_space<vmem>>, vector<32x128xf32>
    %4 = arith.truncf %3 : vector<32x128xf32> to vector<32x128xbf16>
    %c0_2 = arith.constant 0 : index
    %c0_3 = arith.constant 0 : index
    %c0_4 = arith.constant 0 : index
    %5 = vector.load %arg5[%c0_2, %c0_3, %c0_4] : memref<1x128x384xbf16, #tpu.memory_space<vmem>>, vector<1x128x384xbf16>
    %6 = vector.shape_cast %5 : vector<1x128x384xbf16> to vector<128x384xbf16>
    %cst = arith.constant dense<0.000000e+00> : vector<32x384xf32>
    %7 = tpu.matmul %4, %6, %cst {dimension_numbers = #tpu.dot_dimension_numbers<[1], [0], [0], [1], [0, 0, 1, 1], [], []>} : vector<32x128xbf16>, vector<128x384xbf16>, vector<32x384xf32> -> vector<32x384xf32>
    %c0_5 = arith.constant 0 : index
    %c0_6 = arith.constant 0 : index
    %c0_7 = arith.constant 0 : index
    %8 = vector.load %arg9[%c0_5, %c0_6, %c0_7] : memref<1x8x384xf32, #tpu.memory_space<vmem>>, vector<1x1x384xf32>
    %9 = vector.shape_cast %8 : vector<1x1x384xf32> to vector<1x384xf32>
    %10 = vector.broadcast %9 : vector<1x384xf32> to vector<32x384xf32>
    %11 = arith.addf %7, %10 : vector<32x384xf32>
    %12 = vector.extract_strided_slice %11 {offsets = [0, 0], sizes = [32, 128], strides = [1, 1]} : vector<32x384xf32> to vector<32x128xf32>
    %13 = vector.extract_strided_slice %11 {offsets = [0, 128], sizes = [32, 128], strides = [1, 1]} : vector<32x384xf32> to vector<32x128xf32>
    %14 = vector.extract_strided_slice %11 {offsets = [0, 256], sizes = [32, 128], strides = [1, 1]} : vector<32x384xf32> to vector<32x128xf32>
    %15 = vector.extract_strided_slice %12 {offsets = [0, 0], sizes = [32, 32], strides = [1, 1]} : vector<32x128xf32> to vector<32x32xf32>
    %16 = vector.shape_cast %15 : vector<32x32xf32> to vector<2x16x32xf32>
    %17 = arith.truncf %16 : vector<2x16x32xf32> to vector<2x16x32xbf16>
    %18 = vector.extract_strided_slice %13 {offsets = [0, 0], sizes = [32, 32], strides = [1, 1]} : vector<32x128xf32> to vector<32x32xf32>
    %19 = vector.shape_cast %18 : vector<32x32xf32> to vector<2x16x32xf32>
    %20 = arith.truncf %19 : vector<2x16x32xf32> to vector<2x16x32xbf16>
    %21 = vector.extract_strided_slice %14 {offsets = [0, 0], sizes = [32, 32], strides = [1, 1]} : vector<32x128xf32> to vector<32x32xf32>
    %22 = vector.shape_cast %21 : vector<32x32xf32> to vector<2x16x32xf32>
    %23 = arith.truncf %22 : vector<2x16x32xf32> to vector<2x16x32xbf16>
    "tpu.trace_start"() <{level = 10 : i32, message = "bqd,bkd->bqk"}> : () -> ()
    %cst_8 = arith.constant dense<0.000000e+00> : vector<2x16x16xf32>
    %24 = tpu.matmul %17, %20, %cst_8 {dimension_numbers = #tpu.dot_dimension_numbers<[2], [2], [1], [1], [0, 0, 0, 1, 1, 1], [0], [0]>} : vector<2x16x32xbf16>, vector<2x16x32xbf16>, vector<2x16x16xf32> -> vector<2x16x16xf32>
    "tpu.trace_stop"() : () -> ()
    %cst_9 = arith.constant 0.176776692 : f32
    %25 = vector.broadcast %cst_9 : f32 to vector<2x16x16xf32>
    %26 = arith.mulf %24, %25 : vector<2x16x16xf32>
    %cst_10 = arith.constant dense<0xFF800000> : vector<2x16xf32>
    %27 = vector.multi_reduction <maximumf>, %26, %cst_10 [2] : vector<2x16x16xf32> to vector<2x16xf32>
    %28 = vector.shape_cast %27 : vector<2x16xf32> to vector<2x16x1xf32>
    %29 = vector.broadcast %28 : vector<2x16x1xf32> to vector<2x16x16xf32>
    %30 = arith.subf %26, %29 : vector<2x16x16xf32>
    %31 = math.exp %30 : vector<2x16x16xf32>
    %cst_11 = arith.constant dense<0.000000e+00> : vector<2x16xf32>
    %32 = vector.multi_reduction <add>, %31, %cst_11 [2] : vector<2x16x16xf32> to vector<2x16xf32>
    %33 = vector.shape_cast %32 : vector<2x16xf32> to vector<2x16x1xf32>
    %34 = vector.broadcast %33 : vector<2x16x1xf32> to vector<2x16x16xf32>
    %35 = arith.divf %31, %34 : vector<2x16x16xf32>
    %36 = arith.truncf %35 : vector<2x16x16xf32> to vector<2x16x16xbf16>
    "tpu.trace_start"() <{level = 10 : i32, message = "bqk,bkd->bqd"}> : () -> ()
    %cst_12 = arith.constant dense<0.000000e+00> : vector<2x16x32xf32>
    %37 = tpu.matmul %36, %23, %cst_12 {dimension_numbers = #tpu.dot_dimension_numbers<[2], [1], [1], [2], [0, 0, 0, 1, 1, 2], [0], [0]>} : vector<2x16x16xbf16>, vector<2x16x32xbf16>, vector<2x16x32xf32> -> vector<2x16x32xf32>
    "tpu.trace_stop"() : () -> ()
    %38 = vector.extract_strided_slice %12 {offsets = [0, 32], sizes = [32, 32], strides = [1, 1]} : vector<32x128xf32> to vector<32x32xf32>
    %39 = vector.shape_cast %38 : vector<32x32xf32> to vector<2x16x32xf32>
    %40 = arith.truncf %39 : vector<2x16x32xf32> to vector<2x16x32xbf16>
    %41 = vector.extract_strided_slice %13 {offsets = [0, 32], sizes = [32, 32], strides = [1, 1]} : vector<32x128xf32> to vector<32x32xf32>
    %42 = vector.shape_cast %41 : vector<32x32xf32> to vector<2x16x32xf32>
    %43 = arith.truncf %42 : vector<2x16x32xf32> to vector<2x16x32xbf16>
    %44 = vector.extract_strided_slice %14 {offsets = [0, 32], sizes = [32, 32], strides = [1, 1]} : vector<32x128xf32> to vector<32x32xf32>
    %45 = vector.shape_cast %44 : vector<32x32xf32> to vector<2x16x32xf32>
    %46 = arith.truncf %45 : vector<2x16x32xf32> to vector<2x16x32xbf16>
    "tpu.trace_start"() <{level = 10 : i32, message = "bqd,bkd->bqk"}> : () -> ()
    %cst_13 = arith.constant dense<0.000000e+00> : vector<2x16x16xf32>
    %47 = tpu.matmul %40, %43, %cst_13 {dimension_numbers = #tpu.dot_dimension_numbers<[2], [2], [1], [1], [0, 0, 0, 1, 1, 1], [0], [0]>} : vector<2x16x32xbf16>, vector<2x16x32xbf16>, vector<2x16x16xf32> -> vector<2x16x16xf32>
    "tpu.trace_stop"() : () -> ()
    %cst_14 = arith.constant 0.176776692 : f32
    %48 = vector.broadcast %cst_14 : f32 to vector<2x16x16xf32>
    %49 = arith.mulf %47, %48 : vector<2x16x16xf32>
    %cst_15 = arith.constant dense<0xFF800000> : vector<2x16xf32>
    %50 = vector.multi_reduction <maximumf>, %49, %cst_15 [2] : vector<2x16x16xf32> to vector<2x16xf32>
    %51 = vector.shape_cast %50 : vector<2x16xf32> to vector<2x16x1xf32>
    %52 = vector.broadcast %51 : vector<2x16x1xf32> to vector<2x16x16xf32>
    %53 = arith.subf %49, %52 : vector<2x16x16xf32>
    %54 = math.exp %53 : vector<2x16x16xf32>
    %cst_16 = arith.constant dense<0.000000e+00> : vector<2x16xf32>
    %55 = vector.multi_reduction <add>, %54, %cst_16 [2] : vector<2x16x16xf32> to vector<2x16xf32>
    %56 = vector.shape_cast %55 : vector<2x16xf32> to vector<2x16x1xf32>
    %57 = vector.broadcast %56 : vector<2x16x1xf32> to vector<2x16x16xf32>
    %58 = arith.divf %54, %57 : vector<2x16x16xf32>
    %59 = arith.truncf %58 : vector<2x16x16xf32> to vector<2x16x16xbf16>
    "tpu.trace_start"() <{level = 10 : i32, message = "bqk,bkd->bqd"}> : () -> ()
    %cst_17 = arith.constant dense<0.000000e+00> : vector<2x16x32xf32>
    %60 = tpu.matmul %59, %46, %cst_17 {dimension_numbers = #tpu.dot_dimension_numbers<[2], [1], [1], [2], [0, 0, 0, 1, 1, 2], [0], [0]>} : vector<2x16x16xbf16>, vector<2x16x32xbf16>, vector<2x16x32xf32> -> vector<2x16x32xf32>
    "tpu.trace_stop"() : () -> ()
    %61 = vector.extract_strided_slice %12 {offsets = [0, 64], sizes = [32, 32], strides = [1, 1]} : vector<32x128xf32> to vector<32x32xf32>
    %62 = vector.shape_cast %61 : vector<32x32xf32> to vector<2x16x32xf32>
    %63 = arith.truncf %62 : vector<2x16x32xf32> to vector<2x16x32xbf16>
    %64 = vector.extract_strided_slice %13 {offsets = [0, 64], sizes = [32, 32], strides = [1, 1]} : vector<32x128xf32> to vector<32x32xf32>
    %65 = vector.shape_cast %64 : vector<32x32xf32> to vector<2x16x32xf32>
    %66 = arith.truncf %65 : vector<2x16x32xf32> to vector<2x16x32xbf16>
    %67 = vector.extract_strided_slice %14 {offsets = [0, 64], sizes = [32, 32], strides = [1, 1]} : vector<32x128xf32> to vector<32x32xf32>
    %68 = vector.shape_cast %67 : vector<32x32xf32> to vector<2x16x32xf32>
    %69 = arith.truncf %68 : vector<2x16x32xf32> to vector<2x16x32xbf16>
    "tpu.trace_start"() <{level = 10 : i32, message = "bqd,bkd->bqk"}> : () -> ()
    %cst_18 = arith.constant dense<0.000000e+00> : vector<2x16x16xf32>
    %70 = tpu.matmul %63, %66, %cst_18 {dimension_numbers = #tpu.dot_dimension_numbers<[2], [2], [1], [1], [0, 0, 0, 1, 1, 1], [0], [0]>} : vector<2x16x32xbf16>, vector<2x16x32xbf16>, vector<2x16x16xf32> -> vector<2x16x16xf32>
    "tpu.trace_stop"() : () -> ()
    %cst_19 = arith.constant 0.176776692 : f32
    %71 = vector.broadcast %cst_19 : f32 to vector<2x16x16xf32>
    %72 = arith.mulf %70, %71 : vector<2x16x16xf32>
    %cst_20 = arith.constant dense<0xFF800000> : vector<2x16xf32>
    %73 = vector.multi_reduction <maximumf>, %72, %cst_20 [2] : vector<2x16x16xf32> to vector<2x16xf32>
    %74 = vector.shape_cast %73 : vector<2x16xf32> to vector<2x16x1xf32>
    %75 = vector.broadcast %74 : vector<2x16x1xf32> to vector<2x16x16xf32>
    %76 = arith.subf %72, %75 : vector<2x16x16xf32>
    %77 = math.exp %76 : vector<2x16x16xf32>
    %cst_21 = arith.constant dense<0.000000e+00> : vector<2x16xf32>
    %78 = vector.multi_reduction <add>, %77, %cst_21 [2] : vector<2x16x16xf32> to vector<2x16xf32>
    %79 = vector.shape_cast %78 : vector<2x16xf32> to vector<2x16x1xf32>
    %80 = vector.broadcast %79 : vector<2x16x1xf32> to vector<2x16x16xf32>
    %81 = arith.divf %77, %80 : vector<2x16x16xf32>
    %82 = arith.truncf %81 : vector<2x16x16xf32> to vector<2x16x16xbf16>
    "tpu.trace_start"() <{level = 10 : i32, message = "bqk,bkd->bqd"}> : () -> ()
    %cst_22 = arith.constant dense<0.000000e+00> : vector<2x16x32xf32>
    %83 = tpu.matmul %82, %69, %cst_22 {dimension_numbers = #tpu.dot_dimension_numbers<[2], [1], [1], [2], [0, 0, 0, 1, 1, 2], [0], [0]>} : vector<2x16x16xbf16>, vector<2x16x32xbf16>, vector<2x16x32xf32> -> vector<2x16x32xf32>
    "tpu.trace_stop"() : () -> ()
    %84 = vector.extract_strided_slice %12 {offsets = [0, 96], sizes = [32, 32], strides = [1, 1]} : vector<32x128xf32> to vector<32x32xf32>
    %85 = vector.shape_cast %84 : vector<32x32xf32> to vector<2x16x32xf32>
    %86 = arith.truncf %85 : vector<2x16x32xf32> to vector<2x16x32xbf16>
    %87 = vector.extract_strided_slice %13 {offsets = [0, 96], sizes = [32, 32], strides = [1, 1]} : vector<32x128xf32> to vector<32x32xf32>
    %88 = vector.shape_cast %87 : vector<32x32xf32> to vector<2x16x32xf32>
    %89 = arith.truncf %88 : vector<2x16x32xf32> to vector<2x16x32xbf16>
    %90 = vector.extract_strided_slice %14 {offsets = [0, 96], sizes = [32, 32], strides = [1, 1]} : vector<32x128xf32> to vector<32x32xf32>
    %91 = vector.shape_cast %90 : vector<32x32xf32> to vector<2x16x32xf32>
    %92 = arith.truncf %91 : vector<2x16x32xf32> to vector<2x16x32xbf16>
    "tpu.trace_start"() <{level = 10 : i32, message = "bqd,bkd->bqk"}> : () -> ()
    %cst_23 = arith.constant dense<0.000000e+00> : vector<2x16x16xf32>
    %93 = tpu.matmul %86, %89, %cst_23 {dimension_numbers = #tpu.dot_dimension_numbers<[2], [2], [1], [1], [0, 0, 0, 1, 1, 1], [0], [0]>} : vector<2x16x32xbf16>, vector<2x16x32xbf16>, vector<2x16x16xf32> -> vector<2x16x16xf32>
    "tpu.trace_stop"() : () -> ()
    %cst_24 = arith.constant 0.176776692 : f32
    %94 = vector.broadcast %cst_24 : f32 to vector<2x16x16xf32>
    %95 = arith.mulf %93, %94 : vector<2x16x16xf32>
    %cst_25 = arith.constant dense<0xFF800000> : vector<2x16xf32>
    %96 = vector.multi_reduction <maximumf>, %95, %cst_25 [2] : vector<2x16x16xf32> to vector<2x16xf32>
    %97 = vector.shape_cast %96 : vector<2x16xf32> to vector<2x16x1xf32>
    %98 = vector.broadcast %97 : vector<2x16x1xf32> to vector<2x16x16xf32>
    %99 = arith.subf %95, %98 : vector<2x16x16xf32>
    %100 = math.exp %99 : vector<2x16x16xf32>
    %cst_26 = arith.constant dense<0.000000e+00> : vector<2x16xf32>
    %101 = vector.multi_reduction <add>, %100, %cst_26 [2] : vector<2x16x16xf32> to vector<2x16xf32>
    %102 = vector.shape_cast %101 : vector<2x16xf32> to vector<2x16x1xf32>
    %103 = vector.broadcast %102 : vector<2x16x1xf32> to vector<2x16x16xf32>
    %104 = arith.divf %100, %103 : vector<2x16x16xf32>
    %105 = arith.truncf %104 : vector<2x16x16xf32> to vector<2x16x16xbf16>
    "tpu.trace_start"() <{level = 10 : i32, message = "bqk,bkd->bqd"}> : () -> ()
    %cst_27 = arith.constant dense<0.000000e+00> : vector<2x16x32xf32>
    %106 = tpu.matmul %105, %92, %cst_27 {dimension_numbers = #tpu.dot_dimension_numbers<[2], [1], [1], [2], [0, 0, 0, 1, 1, 2], [0], [0]>} : vector<2x16x16xbf16>, vector<2x16x32xbf16>, vector<2x16x32xf32> -> vector<2x16x32xf32>
    "tpu.trace_stop"() : () -> ()
    %107 = tpu.concatenate %37, %60, %83, %106 in 2 : vector<2x16x32xf32>, vector<2x16x32xf32>, vector<2x16x32xf32>, vector<2x16x32xf32> -> vector<2x16x128xf32>
    %108 = vector.shape_cast %107 : vector<2x16x128xf32> to vector<32x128xf32>
    %109 = arith.truncf %108 : vector<32x128xf32> to vector<32x128xbf16>
    %c0_28 = arith.constant 0 : index
    %c0_29 = arith.constant 0 : index
    %c0_30 = arith.constant 0 : index
    %110 = vector.load %arg6[%c0_28, %c0_29, %c0_30] : memref<1x128x128xbf16, #tpu.memory_space<vmem>>, vector<1x128x128xbf16>
    %111 = vector.shape_cast %110 : vector<1x128x128xbf16> to vector<128x128xbf16>
    %cst_31 = arith.constant dense<0.000000e+00> : vector<32x128xf32>
    %112 = tpu.matmul %109, %111, %cst_31 {dimension_numbers = #tpu.dot_dimension_numbers<[1], [0], [0], [1], [0, 0, 1, 1], [], []>} : vector<32x128xbf16>, vector<128x128xbf16>, vector<32x128xf32> -> vector<32x128xf32>
    %c0_32 = arith.constant 0 : index
    %c1 = arith.constant 1 : index
    %c0_33 = arith.constant 0 : index
    %113 = vector.load %arg9[%c0_32, %c1, %c0_33] : memref<1x8x384xf32, #tpu.memory_space<vmem>>, vector<1x1x128xf32>
    %114 = vector.shape_cast %113 : vector<1x1x128xf32> to vector<1x128xf32>
    %115 = vector.broadcast %114 : vector<1x128xf32> to vector<32x128xf32>
    %116 = arith.addf %112, %115 : vector<32x128xf32>
    %117 = arith.addf %3, %116 : vector<32x128xf32>
    %c0_34 = arith.constant 0 : index
    %c2 = arith.constant 2 : index
    %c0_35 = arith.constant 0 : index
    %118 = vector.load %arg9[%c0_34, %c2, %c0_35] : memref<1x8x384xf32, #tpu.memory_space<vmem>>, vector<1x1x128xf32>
    %119 = vector.shape_cast %118 : vector<1x1x128xf32> to vector<1x128xf32>
    %c0_36 = arith.constant 0 : index
    %c3 = arith.constant 3 : index
    %c0_37 = arith.constant 0 : index
    %120 = vector.load %arg9[%c0_36, %c3, %c0_37] : memref<1x8x384xf32, #tpu.memory_space<vmem>>, vector<1x1x128xf32>
    %121 = vector.shape_cast %120 : vector<1x1x128xf32> to vector<1x128xf32>
    %cst_38 = arith.constant dense<0.000000e+00> : vector<32xf32>
    %122 = vector.multi_reduction <add>, %117, %cst_38 [1] : vector<32x128xf32> to vector<32xf32>
    %123 = vector.shape_cast %122 : vector<32xf32> to vector<32x1xf32>
    %cst_39 = arith.constant 1.280000e+02 : f32
    %124 = vector.broadcast %cst_39 : f32 to vector<32x1xf32>
    %125 = arith.divf %123, %124 : vector<32x1xf32>
    %126 = vector.broadcast %125 : vector<32x1xf32> to vector<32x128xf32>
    %127 = arith.subf %117, %126 : vector<32x128xf32>
    %128 = arith.mulf %127, %127 : vector<32x128xf32>
    %cst_40 = arith.constant dense<0.000000e+00> : vector<32xf32>
    %129 = vector.multi_reduction <add>, %128, %cst_40 [1] : vector<32x128xf32> to vector<32xf32>
    %130 = vector.shape_cast %129 : vector<32xf32> to vector<32x1xf32>
    %cst_41 = arith.constant 1.280000e+02 : f32
    %131 = vector.broadcast %cst_41 : f32 to vector<32x1xf32>
    %132 = arith.divf %130, %131 : vector<32x1xf32>
    %133 = vector.broadcast %125 : vector<32x1xf32> to vector<32x128xf32>
    %134 = arith.subf %117, %133 : vector<32x128xf32>
    %cst_42 = arith.constant 9.99999974E-6 : f32
    %135 = vector.broadcast %cst_42 : f32 to vector<32x1xf32>
    %136 = arith.addf %132, %135 : vector<32x1xf32>
    %137 = math.rsqrt %136 : vector<32x1xf32>
    %138 = vector.broadcast %137 : vector<32x1xf32> to vector<32x128xf32>
    %139 = arith.mulf %134, %138 : vector<32x128xf32>
    %140 = vector.broadcast %119 : vector<1x128xf32> to vector<32x128xf32>
    %141 = arith.mulf %139, %140 : vector<32x128xf32>
    %142 = vector.broadcast %121 : vector<1x128xf32> to vector<32x128xf32>
    %143 = arith.addf %141, %142 : vector<32x128xf32>
    %144 = arith.truncf %143 : vector<32x128xf32> to vector<32x128xbf16>
    %c0_43 = arith.constant 0 : index
    %c0_44 = arith.constant 0 : index
    %c0_45 = arith.constant 0 : index
    %145 = vector.load %arg7[%c0_43, %c0_44, %c0_45] : memref<1x128x256xbf16, #tpu.memory_space<vmem>>, vector<1x128x256xbf16>
    %146 = vector.shape_cast %145 : vector<1x128x256xbf16> to vector<128x256xbf16>
    %cst_46 = arith.constant dense<0.000000e+00> : vector<32x256xf32>
    %147 = tpu.matmul %144, %146, %cst_46 {dimension_numbers = #tpu.dot_dimension_numbers<[1], [0], [0], [1], [0, 0, 1, 1], [], []>} : vector<32x128xbf16>, vector<128x256xbf16>, vector<32x256xf32> -> vector<32x256xf32>
    %c0_47 = arith.constant 0 : index
    %c4 = arith.constant 4 : index
    %c0_48 = arith.constant 0 : index
    %148 = vector.load %arg9[%c0_47, %c4, %c0_48] : memref<1x8x384xf32, #tpu.memory_space<vmem>>, vector<1x1x256xf32>
    %149 = vector.shape_cast %148 : vector<1x1x256xf32> to vector<1x256xf32>
    %150 = vector.broadcast %149 : vector<1x256xf32> to vector<32x256xf32>
    %151 = arith.addf %147, %150 : vector<32x256xf32>
    %cst_49 = arith.constant 0.000000e+00 : f32
    %152 = vector.broadcast %cst_49 : f32 to vector<32x256xf32>
    %153 = arith.maximumf %151, %152 : vector<32x256xf32>
    %154 = arith.truncf %153 : vector<32x256xf32> to vector<32x256xbf16>
    %c0_50 = arith.constant 0 : index
    %c0_51 = arith.constant 0 : index
    %c0_52 = arith.constant 0 : index
    %155 = vector.load %arg8[%c0_50, %c0_51, %c0_52] : memref<1x256x128xbf16, #tpu.memory_space<vmem>>, vector<1x256x128xbf16>
    %156 = vector.shape_cast %155 : vector<1x256x128xbf16> to vector<256x128xbf16>
    %cst_53 = arith.constant dense<0.000000e+00> : vector<32x128xf32>
    %157 = tpu.matmul %154, %156, %cst_53 {dimension_numbers = #tpu.dot_dimension_numbers<[1], [0], [0], [1], [0, 0, 1, 1], [], []>} : vector<32x256xbf16>, vector<256x128xbf16>, vector<32x128xf32> -> vector<32x128xf32>
    %c0_54 = arith.constant 0 : index
    %c5 = arith.constant 5 : index
    %c0_55 = arith.constant 0 : index
    %158 = vector.load %arg9[%c0_54, %c5, %c0_55] : memref<1x8x384xf32, #tpu.memory_space<vmem>>, vector<1x1x128xf32>
    %159 = vector.shape_cast %158 : vector<1x1x128xf32> to vector<1x128xf32>
    %160 = vector.broadcast %159 : vector<1x128xf32> to vector<32x128xf32>
    %161 = arith.addf %157, %160 : vector<32x128xf32>
    %162 = arith.addf %143, %161 : vector<32x128xf32>
    %c0_56 = arith.constant 0 : index
    %c6 = arith.constant 6 : index
    %c0_57 = arith.constant 0 : index
    %163 = vector.load %arg9[%c0_56, %c6, %c0_57] : memref<1x8x384xf32, #tpu.memory_space<vmem>>, vector<1x1x128xf32>
    %164 = vector.shape_cast %163 : vector<1x1x128xf32> to vector<1x128xf32>
    %c0_58 = arith.constant 0 : index
    %c7 = arith.constant 7 : index
    %c0_59 = arith.constant 0 : index
    %165 = vector.load %arg9[%c0_58, %c7, %c0_59] : memref<1x8x384xf32, #tpu.memory_space<vmem>>, vector<1x1x128xf32>
    %166 = vector.shape_cast %165 : vector<1x1x128xf32> to vector<1x128xf32>
    %cst_60 = arith.constant dense<0.000000e+00> : vector<32xf32>
    %167 = vector.multi_reduction <add>, %162, %cst_60 [1] : vector<32x128xf32> to vector<32xf32>
    %168 = vector.shape_cast %167 : vector<32xf32> to vector<32x1xf32>
    %cst_61 = arith.constant 1.280000e+02 : f32
    %169 = vector.broadcast %cst_61 : f32 to vector<32x1xf32>
    %170 = arith.divf %168, %169 : vector<32x1xf32>
    %171 = vector.broadcast %170 : vector<32x1xf32> to vector<32x128xf32>
    %172 = arith.subf %162, %171 : vector<32x128xf32>
    %173 = arith.mulf %172, %172 : vector<32x128xf32>
    %cst_62 = arith.constant dense<0.000000e+00> : vector<32xf32>
    %174 = vector.multi_reduction <add>, %173, %cst_62 [1] : vector<32x128xf32> to vector<32xf32>
    %175 = vector.shape_cast %174 : vector<32xf32> to vector<32x1xf32>
    %cst_63 = arith.constant 1.280000e+02 : f32
    %176 = vector.broadcast %cst_63 : f32 to vector<32x1xf32>
    %177 = arith.divf %175, %176 : vector<32x1xf32>
    %178 = vector.broadcast %170 : vector<32x1xf32> to vector<32x128xf32>
    %179 = arith.subf %162, %178 : vector<32x128xf32>
    %cst_64 = arith.constant 9.99999974E-6 : f32
    %180 = vector.broadcast %cst_64 : f32 to vector<32x1xf32>
    %181 = arith.addf %177, %180 : vector<32x1xf32>
    %182 = math.rsqrt %181 : vector<32x1xf32>
    %183 = vector.broadcast %182 : vector<32x1xf32> to vector<32x128xf32>
    %184 = arith.mulf %179, %183 : vector<32x128xf32>
    %185 = vector.broadcast %164 : vector<1x128xf32> to vector<32x128xf32>
    %186 = arith.mulf %184, %185 : vector<32x128xf32>
    %187 = vector.broadcast %166 : vector<1x128xf32> to vector<32x128xf32>
    %188 = arith.addf %186, %187 : vector<32x128xf32>
    %c0_65 = arith.constant 0 : index
    %c0_66 = arith.constant 0 : index
    %189 = vector.load %arg12[%c0_65, %c0_66] : memref<32x128xf32, #tpu.memory_space<vmem>>, vector<32x128xf32>
    tpu.vector_store %arg12[%c0_65, %c0_66], %188 {strides = array<i32>} : memref<32x128xf32, #tpu.memory_space<vmem>>, vector<32x128xf32>,
    %c1_i32 = arith.constant 1 : i32
    %190 = arith.cmpi eq, %arg1, %c1_i32 : i32
    %191 = arith.extui %190 : i1 to i32
    %c0_i32_67 = arith.constant 0 : i32
    %192 = arith.cmpi ne, %191, %c0_i32_67 : i32
    scf.if %192 {
      %193 = arith.truncf %188 : vector<32x128xf32> to vector<32x128xbf16>
      %c0_68 = arith.constant 0 : index
      %c0_69 = arith.constant 0 : index
      %194 = vector.load %arg10[%c0_68, %c0_69] : memref<128x128xbf16, #tpu.memory_space<vmem>>, vector<128x128xbf16>
      %cst_70 = arith.constant dense<0.000000e+00> : vector<32x128xf32>
      %195 = tpu.matmul %193, %194, %cst_70 {dimension_numbers = #tpu.dot_dimension_numbers<[1], [0], [0], [1], [0, 0, 1, 1], [], []>} : vector<32x128xbf16>, vector<128x128xbf16>, vector<32x128xf32> -> vector<32x128xf32>
      %c3_71 = arith.constant 3 : index
      %c0_72 = arith.constant 0 : index
      %196 = vector.load %arg3[%c3_71, %c0_72] : memref<4x128xf32, #tpu.memory_space<vmem>>, vector<1x128xf32>
      %197 = vector.broadcast %196 : vector<1x128xf32> to vector<32x128xf32>
      %198 = arith.addf %195, %197 : vector<32x128xf32>
      %c0_73 = arith.constant 0 : index
      %c0_74 = arith.constant 0 : index
      %199 = vector.load %arg11[%c0_73, %c0_74] : memref<32x128xf32, #tpu.memory_space<vmem>>, vector<32x128xf32>
      tpu.vector_store %arg11[%c0_73, %c0_74], %198 {strides = array<i32>} : memref<32x128xf32, #tpu.memory_space<vmem>>, vector<32x128xf32>,
    } else {
    }
    return
  }
  func.func @transform_0(%arg0: i32, %arg1: i32) -> (i32, i32) {
    %c0_i32 = arith.constant 0 : i32
    %c0_i32_0 = arith.constant 0 : i32
    return %arg0, %c0_i32 : i32, i32
  }
  func.func @transform_1(%arg0: i32, %arg1: i32) -> (i32, i32) {
    %c0_i32 = arith.constant 0 : i32
    %c0_i32_0 = arith.constant 0 : i32
    %c0_i32_1 = arith.constant 0 : i32
    return %c0_i32, %c0_i32_0 : i32, i32
  }
  func.func @transform_2(%arg0: i32, %arg1: i32) -> (i32, i32) {
    %c0_i32 = arith.constant 0 : i32
    %c0_i32_0 = arith.constant 0 : i32
    %c0_i32_1 = arith.constant 0 : i32
    return %c0_i32, %c0_i32_0 : i32, i32
  }
  func.func @transform_3(%arg0: i32, %arg1: i32) -> (i32, i32, i32) {
    %c0_i32 = arith.constant 0 : i32
    %c0_i32_0 = arith.constant 0 : i32
    %c0_i32_1 = arith.constant 0 : i32
    return %arg1, %c0_i32, %c0_i32_0 : i32, i32, i32
  }
  func.func @transform_4(%arg0: i32, %arg1: i32) -> (i32, i32, i32) {
    %c0_i32 = arith.constant 0 : i32
    %c0_i32_0 = arith.constant 0 : i32
    %c0_i32_1 = arith.constant 0 : i32
    return %arg1, %c0_i32, %c0_i32_0 : i32, i32, i32
  }
  func.func @transform_5(%arg0: i32, %arg1: i32) -> (i32, i32, i32) {
    %c0_i32 = arith.constant 0 : i32
    %c0_i32_0 = arith.constant 0 : i32
    %c0_i32_1 = arith.constant 0 : i32
    return %arg1, %c0_i32, %c0_i32_0 : i32, i32, i32
  }
  func.func @transform_6(%arg0: i32, %arg1: i32) -> (i32, i32, i32) {
    %c0_i32 = arith.constant 0 : i32
    %c0_i32_0 = arith.constant 0 : i32
    %c0_i32_1 = arith.constant 0 : i32
    return %arg1, %c0_i32, %c0_i32_0 : i32, i32, i32
  }
  func.func @transform_7(%arg0: i32, %arg1: i32) -> (i32, i32, i32) {
    %c0_i32 = arith.constant 0 : i32
    %c0_i32_0 = arith.constant 0 : i32
    %c0_i32_1 = arith.constant 0 : i32
    return %arg1, %c0_i32, %c0_i32_0 : i32, i32, i32
  }
  func.func @transform_8(%arg0: i32, %arg1: i32) -> (i32, i32) {
    %c0_i32 = arith.constant 0 : i32
    %c0_i32_0 = arith.constant 0 : i32
    %c0_i32_1 = arith.constant 0 : i32
    return %c0_i32, %c0_i32_0 : i32, i32
  }
  func.func @transform_9(%arg0: i32, %arg1: i32) -> (i32, i32) {
    %c0_i32 = arith.constant 0 : i32
    %c0_i32_0 = arith.constant 0 : i32
    return %arg0, %c0_i32 : i32, i32
  }
}

</mosaic_0001>

<bundles_post_ra>
// kernel: tpu_custom_call.1
= control target key start
LH: loop header
LB: loop body
LE: loop exit
PB: predicated region body
PF: predicated region fallthrough
CT: control target
= control target key end

     0   :  { %s4999_s0 = inlined_call_operand.hbm [shape: f32[32,128], index: 0, kind: input, shape index: {}]   ;;  %s5000_s1 = inlined_call_operand.hbm [shape: f32[4,128], index: 1, kind: input, shape index: {}]   ;;  %s5001_s2 = inlined_call_operand.hbm [shape: bf16[128,128], index: 2, kind: input, shape index: {}]   ;;  %s5002_s3 = inlined_call_operand.hbm [shape: bf16[2,128,384], index: 3, kind: input, shape index: {}]   ;;  %s5003_s4 = inlined_call_operand.hbm [shape: bf16[2,128,128], index: 4, kind: input, shape index: {}]   ;;  %s5004_s5 = inlined_call_operand.hbm [shape: bf16[2,128,256], index: 5, kind: input, shape index: {}]   ;;  %s5005_s6 = inlined_call_operand.hbm [shape: bf16[2,256,128], index: 6, kind: input, shape index: {}]   ;;  %s5006_s7 = inlined_call_operand.hbm [shape: f32[2,8,384], index: 7, kind: input, shape index: {}]   ;;  %s5007_s8 = inlined_call_operand.hbm [shape: bf16[128,128], index: 8, kind: input, shape index: {}]   ;;  %s5008_s9 = inlined_call_operand.hbm [shape: f32[32,128], index: 9, kind: output, shape index: {}]  }
   0x1   :  { %5036 = sst [smem:[#allocation34_spill]] %s5000_s1 }
   0x2   :  { %5037 = sst [smem:[#allocation35_spill]] %s5002_s3 }
   0x3   :  { %5038 = sst [smem:[#allocation36_spill]] %s5004_s5 }
   0x4   :  { %5039 = sst [smem:[#allocation37_spill]] %s5007_s8 }
   0x5   :  { %5040 = sst [smem:[#allocation38_spill]] %s5008_s9 }
   0x6   :  { %14 = vsyncpa [#allocation4], 0 }
   0x7   :  { %15 = vsyncpa [#allocation7], 0 }
   0x8   :  { %16 = vsyncpa [#allocation10], 0 }
   0x9   :  { %18 = vsyncpa [#allocation10 + $0x1], 0 }
   0xa   :  { %19 = vsyncpa [#allocation13], 0 }
   0xb   :  { %21 = vsyncpa [#allocation13 + $0x1], 0 }
   0xc   :  { %22 = vsyncpa [#allocation16], 0 }
   0xd   :  { %24 = vsyncpa [#allocation16 + $0x1], 0 }
   0xe   :  { %25 = vsyncpa [#allocation5], 0  ;;  %s4232_s30 = smov 0   ;;  %s4234_s10 = smov 0  }
   0xf   :  { %s4236_s11 = smov 0   ;;  %s4238_s12 = smov 0  }
  0x10   :  { %s4240_s13 = smov 0   ;;  %s4242_s14 = smov 0  }
  0x11 LB: > { %5041 = sst [smem:[#allocation26_spill]] %s4140_s10  ;;  %s4261_s15 = sadd.s32 4294967295, %s4156_s14   ;;  %s4156_s14 = sphi %s4242_s14, %s31_s14   ;;  %s4152_s13 = sphi %s4240_s13, %s5090_s13   ;;  %s4148_s12 = sphi %s4238_s12, %s5089_s12   ;;  %s4144_s11 = sphi %s4236_s11, %s5087_s11   ;;  %s4140_s10 = sphi %s4234_s10, %s5086_s10   ;;  %s4136_s30 = sphi %s4232_s30, %s5085_s30  }
  0x12   : > { %5042 = sst [smem:[#allocation27_spill]] %s4144_s11  ;;  %p131_p0 = scmp.ne.s32.totalorder %s4140_s10, %s4136_s30 }
  0x13   : > { %5043 = sst [smem:[#allocation28_spill]] %s4148_s12  ;;  %p5009_p1 = scmp.eq.s32.totalorder %s4261_s15, 0 }
  0x14   : > { %5044 = sst [smem:[#allocation29_spill]] %s4156_s14  ;;  %p3022_p2 = scmp.ge.s32.totalorder %s4156_s14, 1 }
  0x15   : > { %5045 = sst [smem:[#allocation30_spill]] %s4261_s15  ;;  %p293_p3 = scmp.lt.s32.totalorder %s4156_s14, 3 }
  0x16   : > { %p4269_p4 = por %p5009_p1, %p131_p0  ;;  %s4158_s18 = smov [#allocation6]  }
  0x17   : > { %p4273_p5 = pnand %p3022_p2, %p293_p3  ;;  %s322_s19 = sshll.u32 %s4158_s18, 4  ;;  %s323_s19 = int_to_ptr.vmem [resolvable:$true] %s322_s19 }
  0x18   : > { %s5046_s16 = scalar_select %p4269_p4, 1, 0 }
  0x19   : > { %s5048_s17 = scalar_select %p4273_p5, 1, 0 }
  0x1a   : > { %5047 = sst [smem:[#allocation31_spill]] %s5046_s16  ;;  %p3469_p6 = pneg %p4273_p5 }
  0x1b   : > { %s4159_s21 = smov [#allocation17]   ;;  %s5050_s1 = sld [smem:[#allocation34_spill]] }
  0x1c   : > { %p4281_p7 = pnand %p3469_p6, %p5009_p1  ;;  %s345_s22 = sshll.u32 %s4159_s21, 4  ;;  %s4285_s22 = int_to_ptr.vmem [resolvable:$true] %s345_s22 }
  0x1e   : > { %s5049_s20 = scalar_select %p4281_p7, 1, 0 }
  0x1f   : > { %p4295_p9 = pneg %p4281_p7 }
  0x21   : > { %s3794_s25 = scalar_lea.hbm %s5050_s1, 64 }
  0x22   : > { %p3795_p8 = scmp.ne.s32.totalorder %s5050_s1, %s3794_s25  ;;  %p3801_p12 = scmp.lt.u32.totalorder %s3794_s25, %s5050_s1 }
  0x23   : > { %s5051_s28 = scalar_select %p4295_p9, 1, 0 }
  0x24   : > { %p3797_p10 = pnand %p4295_p9, %p3795_p8 }
  0x26   : > { %p3798_p11 = pneg %p3797_p10 }
  0x28   : > { %p3803_p13 = pnand %p3801_p12, %p3798_p11 }
  0x2a   : > { %3806 = shalt.err (!%p3803_p13)
}
  0x2b   : > { %s3807_s18 = scalar_lea.vmem %s323_s19, 64  ;;  %p3815_p6 = scmp.lt.s32.totalorder %s323_s19, %s323_s19 }
  0x2c   : > { %p3808_p0 = scmp.ne.s32.totalorder %s323_s19, %s3807_s18  ;;  %p3816_p1 = scmp.lt.s32.totalorder %s3807_s18, %s3807_s18 }
  0x2e   : > { %p3810_p2 = pnand %p3808_p0, %p4295_p9  ;;  %p3817_p4 = por %p3816_p1, %p3815_p6 }
  0x30   : > { %p3811_p3 = pneg %p3810_p2 }
  0x32   : > { %p3818_p5 = pnand %p3817_p4, %p3811_p3 }
  0x34   : > { %3821 = shalt.err (!%p3818_p5)
}
  0x35   : > { %3475 = dma.hbm_to_vmem [thread:$0]  (!%p4281_p7), %s5050_s1, 64, %s323_s19, [#allocation7]  }
  0x36   : > { %s5052_s8 = sld [smem:[#allocation37_spill]] }
  0x3c   : > { %s3822_s26 = scalar_lea.hbm %s5052_s8, 1024 }
  0x3d   : > { %p3823_p8 = scmp.ne.s32.totalorder %s5052_s8, %s3822_s26  ;;  %p3829_p4 = scmp.lt.u32.totalorder %s3822_s26, %s5052_s8 }
  0x3f   : > { %p3825_p10 = pnand %p3823_p8, %p4295_p9 }
  0x41   : > { %p3826_p1 = pneg %p3825_p10 }
  0x43   : > { %p3831_p5 = pnand %p3829_p4, %p3826_p1 }
  0x45   : > { %3834 = shalt.err (!%p3831_p5)
}
  0x46   : > { %s3835_s19 = scalar_lea.vmem %s4285_s22, 1024  ;;  %p3843_p0 = scmp.lt.s32.totalorder %s4285_s22, %s4285_s22 }
  0x47   : > { %p3836_p11 = scmp.ne.s32.totalorder %s4285_s22, %s3835_s19  ;;  %p3844_p2 = scmp.lt.s32.totalorder %s3835_s19, %s3835_s19 }
  0x49   : > { %p3838_p12 = pnand %p3836_p11, %p4295_p9  ;;  %p3845_p3 = por %p3844_p2, %p3843_p0 }
  0x4b   : > { %p3839_p13 = pneg %p3838_p12 }
  0x4d   : > { %p3846_p6 = pnand %p3845_p3, %p3839_p13 }
  0x4f   : > { %3849 = shalt.err (!%p3846_p6)
}
  0x50   : > { %s5012_s21 = smov 64   ;;  %s5014_s23 = smov 4  }
  0x51   : > { %3481 = dma.hbm_to_vmem [thread:$0]  (!%p4281_p7), %s5052_s8, 1024, %s4285_s22, [#allocation16], %s5012_s21, %s5012_s21, %s5014_s23  }
  0x52   : > { %s40_s26 = sadd.s32 1, %s4152_s13  ;;  %s118_s27 = sadd.s32 1, %s4144_s11 }
  0x53   : > { %p41_p8 = scmp.ge.s32.totalorder %s40_s26, 2  ;;  %p125_p10 = scmp.ne.s32.totalorder %s4144_s11, %s4140_s10 }
  0x54   : > { %p126_p1 = scmp.eq.s32.totalorder %s4156_s14, 0  ;;  %p3502_p4 = scmp.lt.s32.totalorder %s4156_s14, 2 }
  0x55   : > { %s5092_s26 = smov (%p41_p8, %s40_s26), 0  ;;  %s4346_s29 = sand.u32 1, %s4156_s14  }
  0x56   : > { %5053 = sst [smem:[#allocation32_spill]] %s5092_s26  ;;  %p127_p5 = por %p126_p1, %p125_p10 }
  0x57   : > { %s115_s30 = ssub.s32 %s4152_s13, %s5092_s26  ;;  %s4351_s18 = sand.u32 1, %s4144_s11  }
  0x58   : > { %p116_p11 = scmp.eq.s32.totalorder %s115_s30, 0  ;;  %s3433_s22 = smul.u32 192, %s4351_s18 }
  0x59   : > { %p4354_p12 = pnand %p3502_p4, %p127_p5  ;;  %s3434_s25 = smul.u32 3072, %s4152_s13 }
  0x5a   : > { %s4359_s24 = scalar_select %p116_p11, %s4144_s11, %s118_s27  }
  0x5b   : > { %s5054_s19 = scalar_select %p4354_p12, 1, 0 }
  0x5c   : > { %5055 = sst [smem:[#allocation33_spill]] %s4359_s24  ;;  %s363_s21 = scalar_lea.vmem [#allocation9], %s3433_s22 }
  0x5d   : > { %s370_s23 = sshll.u32 %s363_s21, 4  ;;  %s5056_s3 = sld [smem:[#allocation35_spill]]  ;;  %s4367_s23 = int_to_ptr.vmem [resolvable:$true] %s370_s23 }
  0x5e   : > { %p4374_p0 = pneg %p4354_p12 }
  0x60   : > { %s5057_s27 = scalar_select %p4374_p0, 1, 0 }
  0x63   : > { %s4365_s14 = scalar_lea.hbm %s5056_s3, %s3434_s25  ;;  %s3855_s21 = scalar_lea.hbm %s5056_s3, 6144 }
  0x64   : > { %s3850_s26 = scalar_lea.hbm %s4365_s14, 3072  ;;  %p3856_p6 = scmp.lt.u32.totalorder %s4365_s14, %s5056_s3 }
  0x65   : > { %p3851_p13 = scmp.ne.s32.totalorder %s4365_s14, %s3850_s26  ;;  %p3857_p8 = scmp.lt.u32.totalorder %s3855_s21, %s3850_s26 }
  0x66   : > { %p3859_p1 = scmp.lt.u32.totalorder %s3850_s26, %s4365_s14 }
  0x67   : > { %p3853_p2 = pnand %p4374_p0, %p3851_p13  ;;  %p3858_p10 = por %p3857_p8, %p3856_p6 }
  0x69   : > { %p3854_p3 = pneg %p3853_p2  ;;  %p3860_p4 = por %p3859_p1, %p3858_p10 }
  0x6b   : > { %p3861_p5 = pnand %p3860_p4, %p3854_p3 }
  0x6d   : > { %3864 = shalt.err (!%p3861_p5)
}
  0x6e   : > { %s3865_s30 = scalar_lea.vmem %s4367_s23, 3072  ;;  %s4162_s1 = smov [#allocation9]  }
  0x6f   : > { %p3866_p11 = scmp.ne.s32.totalorder %s4367_s23, %s3865_s30  ;;  %s3870_s8 = sshll.u32 %s4162_s1, 4  ;;  %s3871_s8 = int_to_ptr.vmem [resolvable:$false] %s3870_s8 }
  0x70   : > { %s3872_s22 = scalar_lea.vmem %s3871_s8, 6144  ;;  %p3873_p7 = scmp.lt.s32.totalorder %s4367_s23, %s3871_s8 }
  0x71   : > { %p3868_p13 = pnand %p3866_p11, %p4374_p0  ;;  %p3874_p9 = scmp.lt.s32.totalorder %s3872_s22, %s3865_s30 }
  0x73   : > { %p3869_p2 = pneg %p3868_p13  ;;  %p3875_p6 = por %p3874_p9, %p3873_p7 }
  0x75   : > { %p3876_p8 = pnand %p3875_p6, %p3869_p2 }
  0x77   : > { %3879 = shalt.err (!%p3876_p8)
}
  0x78   : > { %s4163_s26 = smov 192   ;;  %s4164_s21 = smov 12  }
  0x79   : > { %s5058_s25 = scalar_lea.sflag [#allocation10], %s4346_s29  ;;  %s3032_s1 = sshll.u32 %s4351_s18, 7 }
  0x7a   : > { %3485 = dma.hbm_to_vmem [thread:$0]  (!%p4354_p12), %s4365_s14, 3072, %s4367_s23, %s5058_s25, %s4163_s26, %s4163_s26, %s4164_s21  }
  0x7b   : > { %s3155_s30 = sshll.u32 %s4152_s13, 11  ;;  %s5059_s5 = sld [smem:[#allocation36_spill]] }
  0x7c   : > { %s405_s24 = scalar_lea.vmem [#allocation12], %s3032_s1  ;;  %s5030_s9 = scalar_lea.sflag [#allocation13], %s4346_s29 }
  0x7d   : > { %s412_s11 = sshll.u32 %s405_s24, 4  ;;  %s4410_s11 = int_to_ptr.vmem [resolvable:$true] %s412_s11 }
  0x81   : > { %s4406_s3 = scalar_lea.hbm %s5059_s5, %s3155_s30  ;;  %s3885_s26 = scalar_lea.hbm %s5059_s5, 4096 }
  0x82   : > { %s3880_s12 = scalar_lea.hbm %s4406_s3, 2048  ;;  %p3886_p10 = scmp.lt.u32.totalorder %s4406_s3, %s5059_s5 }
  0x83   : > { %p3881_p7 = scmp.ne.s32.totalorder %s4406_s3, %s3880_s12  ;;  %p3887_p1 = scmp.lt.u32.totalorder %s3885_s26, %s3880_s12 }
  0x84   : > { %p3889_p5 = scmp.lt.u32.totalorder %s3880_s12, %s4406_s3 }
  0x85   : > { %p3883_p9 = pnand %p3881_p7, %p4374_p0  ;;  %p3888_p4 = por %p3887_p1, %p3886_p10 }
  0x87   : > { %p3884_p3 = pneg %p3883_p9  ;;  %p3890_p11 = por %p3889_p5, %p3888_p4 }
  0x89   : > { %p3891_p13 = pnand %p3890_p11, %p3884_p3 }
  0x8b   : > { %3894 = shalt.err (!%p3891_p13)
}
  0x8c   : > { %s3895_s24 = scalar_lea.vmem %s4410_s11, 2048  ;;  %s4165_s8 = smov [#allocation12]  }
  0x8d   : > { %p3896_p2 = scmp.ne.s32.totalorder %s4410_s11, %s3895_s24  ;;  %s3900_s22 = sshll.u32 %s4165_s8, 4  ;;  %s3901_s22 = int_to_ptr.vmem [resolvable:$false] %s3900_s22 }
  0x8e   : > { %s3902_s14 = scalar_lea.vmem %s3901_s22, 4096  ;;  %p3903_p7 = scmp.lt.s32.totalorder %s4410_s11, %s3901_s22 }
  0x8f   : > { %p3898_p6 = pnand %p3896_p2, %p4374_p0  ;;  %p3904_p9 = scmp.lt.s32.totalorder %s3902_s14, %s3895_s24 }
  0x91   : > { %p3899_p8 = pneg %p3898_p6  ;;  %p3905_p10 = por %p3904_p9, %p3903_p7 }
  0x93   : > { %p3906_p1 = pnand %p3905_p10, %p3899_p8 }
  0x95   : > { %3909 = shalt.err (!%p3906_p1)
}
  0x96   : > { %s4166_s12 = smov 128   ;;  %s4167_s23 = smov 8  }
  0x97   : > { %3491 = dma.hbm_to_vmem [thread:$0]  (!%p4354_p12), %s4406_s3, 2048, %s4410_s11, %s5030_s9, %s4166_s12, %s4166_s12, %s4167_s23  }
  0x98   : > { %s4444_s25 = scalar_lea.hbm %s5005_s6, %s3155_s30  ;;  %s426_s24 = scalar_lea.vmem [#allocation14], %s3032_s1 }
  0x99   : > { %s433_s8 = sshll.u32 %s426_s24, 4  ;;  %s4168_s22 = smov [#allocation3]   ;;  %s4448_s8 = int_to_ptr.vmem [resolvable:$true] %s433_s8 }
  0x9a   : > { %s308_s14 = sshll.u32 %s4168_s22, 4  ;;  %s4169_s5 = smov [#allocation8]   ;;  %s309_s14 = int_to_ptr.vmem [resolvable:$true] %s308_s14 }
  0x9b   : > { %s332_s16 = sshll.u32 %s4169_s5, 4  ;;  %s3910_s3 = scalar_lea.hbm %s4999_s0, 512  ;;  %s333_s16 = int_to_ptr.vmem [resolvable:$true] %s332_s16 }
  0x9c   : > { %p3911_p3 = scmp.ne.s32.totalorder %s4999_s0, %s3910_s3  ;;  %p5060_p4 = scmp.ne.s32.totalorder %s5051_s28, 0 }
  0x9d   : > { %p3917_p13 = scmp.lt.u32.totalorder %s3910_s3, %s4999_s0 }
  0x9e   : > { %p3913_p5 = pnand %p3911_p3, %p5060_p4 }
  0xa0   : > { %p3914_p11 = pneg %p3913_p5 }
  0xa2   : > { %p3919_p2 = pnand %p3917_p13, %p3914_p11 }
  0xa4   : > { %3922 = shalt.err (!%p3919_p2)
}
  0xa5   : > { %s3923_s26 = scalar_lea.vmem %s309_s14, 512  ;;  %p3931_p9 = scmp.lt.s32.totalorder %s309_s14, %s309_s14 }
  0xa6   : > { %p3924_p6 = scmp.ne.s32.totalorder %s309_s14, %s3923_s26  ;;  %p3932_p10 = scmp.lt.s32.totalorder %s3923_s26, %s3923_s26 }
  0xa8   : > { %p3926_p8 = pnand %p3924_p6, %p5060_p4  ;;  %p3933_p1 = por %p3932_p10, %p3931_p9 }
  0xaa   : > { %p3927_p7 = pneg %p3926_p8 }
  0xac   : > { %p3934_p12 = pnand %p3933_p1, %p3927_p7 }
  0xae   : > { %3937 = shalt.err (!%p3934_p12)
}
  0xaf   : > { %p5061_p3 = scmp.ne.s32.totalorder %s5049_s20, 0  ;;  %s3029_s10 = sshll.u32 %s4351_s18, 6 }
  0xb0   : > { %s3938_s24 = scalar_lea.hbm %s5001_s2, 1024 }
  0xb1   : > { %3472 = dma.hbm_to_vmem [thread:$0]  (!%p5061_p3), %s4999_s0, 512, %s309_s14, [#allocation4], %s4166_s12, %s4166_s12, %s4167_s23  }
  0xb2   : > { %p3939_p12 = scmp.ne.s32.totalorder %s5001_s2, %s3938_s24  ;;  %p3945_p13 = scmp.lt.u32.totalorder %s3938_s24, %s5001_s2 }
  0xb4   : > { %p3941_p5 = pnand %p3939_p12, %p5060_p4 }
  0xb6   : > { %p3942_p11 = pneg %p3941_p5 }
  0xb8   : > { %p3947_p2 = pnand %p3945_p13, %p3942_p11 }
  0xba   : > { %3950 = shalt.err (!%p3947_p2)
}
  0xbb   : > { %s3951_s12 = scalar_lea.vmem %s333_s16, 1024  ;;  %p3959_p9 = scmp.lt.s32.totalorder %s333_s16, %s333_s16 }
  0xbc   : > { %p3952_p6 = scmp.ne.s32.totalorder %s333_s16, %s3951_s12  ;;  %p3960_p10 = scmp.lt.s32.totalorder %s3951_s12, %s3951_s12 }
  0xbe   : > { %p3954_p8 = pnand %p3952_p6, %p5060_p4  ;;  %p3961_p1 = por %p3960_p10, %p3959_p9 }
  0xc0   : > { %p3955_p7 = pneg %p3954_p8 }
  0xc2   : > { %p3962_p0 = pnand %p3961_p1, %p3955_p7 }
  0xc4   : > { %3965 = shalt.err (!%p3962_p0)
}
  0xc5   : > { %s5062_s23 = smov 4   ;;  %s5063_s14 = smov 64  }
  0xc6   : > { %3478 = dma.hbm_to_vmem [thread:$0]  (!%p5061_p3), %s5001_s2, 1024, %s333_s16, [#allocation7], %s5063_s14, %s5063_s14, %s5062_s23  }
  0xc7   : > { %s3154_s5 = sshll.u32 %s4152_s13, 10  ;;  %s384_s20 = scalar_lea.vmem [#allocation11], %s3029_s10 }
  0xc8   : > { %s4497_s15 = scalar_lea.hbm %s5003_s4, %s3154_s5  ;;  %s391_s21 = sshll.u32 %s384_s20, 4  ;;  %s4499_s21 = int_to_ptr.vmem [resolvable:$true] %s391_s21 }
  0xc9   : > { %s3966_s24 = scalar_lea.hbm %s4497_s15, 1024  ;;  %p5064_p4 = scmp.ne.s32.totalorder %s5057_s27, 0 }
  0xca   : > { %p3967_p0 = scmp.ne.s32.totalorder %s4497_s15, %s3966_s24  ;;  %s3971_s3 = scalar_lea.hbm %s5003_s4, 2048 }
  0xcb   : > { %p3972_p3 = scmp.lt.u32.totalorder %s4497_s15, %s5003_s4  ;;  %p3973_p11 = scmp.lt.u32.totalorder %s3971_s3, %s3966_s24 }
  0xcc   : > { %p3969_p12 = pnand %p3967_p0, %p5064_p4  ;;  %p3975_p2 = scmp.lt.u32.totalorder %s3966_s24, %s4497_s15 }
  0xcd   : > { %p3974_p13 = por %p3973_p11, %p3972_p3 }
  0xce   : > { %p3970_p5 = pneg %p3969_p12 }
  0xcf   : > { %p3976_p6 = por %p3975_p2, %p3974_p13 }
  0xd1   : > { %p3977_p8 = pnand %p3976_p6, %p3970_p5 }
  0xd3   : > { %3980 = shalt.err (!%p3977_p8)
}
  0xd4   : > { %s3981_s10 = scalar_lea.vmem %s4499_s21, 1024  ;;  %s4170_s12 = smov [#allocation11]  }
  0xd5   : > { %p3982_p7 = scmp.ne.s32.totalorder %s4499_s21, %s3981_s10  ;;  %s3986_s30 = sshll.u32 %s4170_s12, 4  ;;  %s3987_s30 = int_to_ptr.vmem [resolvable:$false] %s3986_s30 }
  0xd6   : > { %s3988_s26 = scalar_lea.vmem %s3987_s30, 2048  ;;  %p3989_p1 = scmp.lt.s32.totalorder %s4499_s21, %s3987_s30 }
  0xd7   : > { %p3984_p9 = pnand %p3982_p7, %p5064_p4  ;;  %p3990_p0 = scmp.lt.s32.totalorder %s3988_s26, %s3981_s10 }
  0xd9   : > { %p3985_p10 = pneg %p3984_p9  ;;  %p3991_p12 = por %p3990_p0, %p3989_p1 }
  0xdb   : > { %p3992_p3 = pnand %p3991_p12, %p3985_p10 }
  0xdd   : > { %3995 = shalt.err (!%p3992_p3)
}
  0xde   : > { %p5065_p5 = scmp.ne.s32.totalorder %s5054_s19, 0  ;;  %s5066_s5 = scalar_lea.sflag [#allocation10], %s4346_s29 }
  0xdf   : > { %s3996_s28 = scalar_lea.hbm %s4444_s25, 2048  ;;  %s4001_s24 = scalar_lea.hbm %s5005_s6, 4096 }
  0xe0   : > { %3488 = dma.hbm_to_vmem [thread:$0]  (!%p5065_p5), %s4497_s15, 1024, %s4499_s21, %s5066_s5, %s5063_s14, %s5063_s14, %s5062_s23  }
  0xe1   : > { %p3997_p11 = scmp.ne.s32.totalorder %s4444_s25, %s3996_s28  ;;  %p4002_p6 = scmp.lt.u32.totalorder %s4444_s25, %s5005_s6 }
  0xe2   : > { %p4003_p8 = scmp.lt.u32.totalorder %s4001_s24, %s3996_s28  ;;  %p4005_p9 = scmp.lt.u32.totalorder %s3996_s28, %s4444_s25 }
  0xe3   : > { %p3999_p13 = pnand %p3997_p11, %p5064_p4 }
  0xe4   : > { %p4004_p7 = por %p4003_p8, %p4002_p6 }
  0xe5   : > { %p4000_p2 = pneg %p3999_p13 }
  0xe6   : > { %p4006_p10 = por %p4005_p9, %p4004_p7 }
  0xe8   : > { %p4007_p1 = pnand %p4006_p10, %p4000_p2 }
  0xea   : > { %4010 = shalt.err (!%p4007_p1)
}
  0xeb   : > { %s4011_s15 = scalar_lea.vmem %s4448_s8, 2048  ;;  %s4171_s21 = smov [#allocation14]  }
  0xec   : > { %p4012_p0 = scmp.ne.s32.totalorder %s4448_s8, %s4011_s15  ;;  %s4016_s3 = sshll.u32 %s4171_s21, 4  ;;  %s4017_s3 = int_to_ptr.vmem [resolvable:$false] %s4016_s3 }
  0xed   : > { %s4018_s11 = scalar_lea.vmem %s4017_s3, 4096  ;;  %p4019_p11 = scmp.lt.s32.totalorder %s4448_s8, %s4017_s3 }
  0xee   : > { %p4014_p12 = pnand %p4012_p0, %p5064_p4  ;;  %p4020_p13 = scmp.lt.s32.totalorder %s4018_s11, %s4011_s15 }
  0xf0   : > { %p4015_p3 = pneg %p4014_p12  ;;  %p4021_p6 = por %p4020_p13, %p4019_p11 }
  0xf2   : > { %p4022_p8 = pnand %p4021_p6, %p4015_p3 }
  0xf4   : > { %4025 = shalt.err (!%p4022_p8)
}
  0xf5   : > { %s5067_s1 = scalar_lea.sflag [#allocation13], %s4346_s29  ;;  %s3435_s10 = smul.u32 24, %s4351_s18 }
  0xf6   : > { %3494 = dma.hbm_to_vmem [thread:$0]  (!%p5065_p5), %s4444_s25, 2048, %s4448_s8, %s5067_s1, %s5063_s14, %s5063_s14, %s5062_s23  }
  0xf7   : > { %s3436_s12 = smul.u32 384, %s4152_s13  ;;  %s447_s28 = scalar_lea.vmem [#allocation15], %s3435_s10 }
  0xf8   : > { %s455_s9 = sshll.u32 %s447_s28, 4  ;;  %s444_s20 = scalar_lea.sflag [#allocation16], %s4346_s29  ;;  %s456_s9 = int_to_ptr.vmem [resolvable:$true] %s455_s9 }
  0xf9   : > { %s4558_s5 = scalar_lea.hbm %s5006_s7, %s3436_s12  ;;  %s4031_s8 = scalar_lea.hbm %s5006_s7, 768 }
  0xfa   : > { %s4026_s24 = scalar_lea.hbm %s4558_s5, 384  ;;  %p4032_p10 = scmp.lt.u32.totalorder %s4558_s5, %s5006_s7 }
  0xfb   : > { %p4027_p2 = scmp.ne.s32.totalorder %s4558_s5, %s4026_s24  ;;  %p4033_p1 = scmp.lt.u32.totalorder %s4031_s8, %s4026_s24 }
  0xfc   : > { %p4035_p12 = scmp.lt.u32.totalorder %s4026_s24, %s4558_s5 }
  0xfd   : > { %p4029_p7 = pnand %p4027_p2, %p5064_p4  ;;  %p4034_p0 = por %p4033_p1, %p4032_p10 }
  0xff   : > { %p4030_p9 = pneg %p4029_p7  ;;  %p4036_p3 = por %p4035_p12, %p4034_p0 }
 0x101   : > { %p4037_p11 = pnand %p4036_p3, %p4030_p9 }
 0x103   : > { %4040 = shalt.err (!%p4037_p11)
}
 0x104   : > { %s4041_s29 = scalar_lea.vmem %s456_s9, 384  ;;  %s4172_s16 = smov [#allocation15]  }
 0x105   : > { %p4042_p13 = scmp.ne.s32.totalorder %s456_s9, %s4041_s29  ;;  %s4046_s22 = sshll.u32 %s4172_s16, 4  ;;  %s4047_s22 = int_to_ptr.vmem [resolvable:$false] %s4046_s22 }
 0x106   : > { %s4048_s15 = scalar_lea.vmem %s4047_s22, 768  ;;  %p4049_p2 = scmp.lt.s32.totalorder %s456_s9, %s4047_s22 }
 0x107   : > { %p4044_p6 = pnand %p4042_p13, %p5064_p4  ;;  %p4050_p7 = scmp.lt.s32.totalorder %s4048_s15, %s4041_s29 }
 0x109   : > { %p4045_p8 = pneg %p4044_p6  ;;  %p4051_p5 = por %p4050_p7, %p4049_p2 }
 0x10b   : > { %p4052_p1 = pnand %p4051_p5, %p4045_p8 }
 0x10d   : > { %4055 = shalt.err (!%p4052_p1)
}
 0x10e   : > { %p5068_p10 = scmp.ne.s32.totalorder %s5054_s19, 0  ;;  %p5069_p9 = scmp.ne.s32.totalorder %s5048_s17, 0 }
 0x10f   : > { %s5070_s21 = sld [smem:[#allocation30_spill]] (!%p5069_p9) }
 0x110   : > { %3497 = dma.hbm_to_vmem [thread:$0]  (!%p5068_p10), %s4558_s5, 384, %s456_s9, %s444_s20  }
 0x111   : > { %464 = sbr.rel (%p5069_p9) target bundleno = 5287 (0x14a7), region = 56 }
 0x115   : > { %p5071_p0 = scmp.eq.s32.totalorder (!%p5069_p9), %s5070_s21, 0 }
 0x118   : > { %4107 = dma.done.wait (%p5071_p0), [#allocation4], 512   ;;  %p5072_p4 = pmov %p5071_p0 }
 0x119   : > { %p5073_p12 = pmov %p5071_p0 }
 0x11a   : > { %4109 = vsyncadd (%p5072_p4), [#allocation4], 4294966784 }
 0x11b   : > { %4111 = dma.done.wait (%p5073_p12), [#allocation7], 1088   ;;  %p5074_p3 = pmov %p5071_p0 }
 0x11c   : > { %s5075_s27 = sld [smem:[#allocation26_spill]]  ;;  %s5076_s19 = sld [smem:[#allocation31_spill]] }
 0x11d   : > { %4113 = vsyncadd (%p5074_p3), [#allocation7], 4294966208  ;;  %s478_s3 = sand.u32 1, %s5070_s21  }
 0x11e   : > { %s479_s17 = scalar_lea.sflag [#allocation10], %s478_s3 }
 0x122   : > { %s480_s11 = sand.u32 1, %s5075_s27   ;;  %p5077_p5 = scmp.ne.s32.totalorder %s5076_s19, 0 }
 0x123   : > { %s3437_s1 = smul.u32 192, %s480_s11 }
 0x125   : > { %s4590_s10 = scalar_lea.vmem [#allocation9], %s3437_s1 }
 0x126   : > { %4115 = dma.done.wait (%p5077_p5), %s479_s17, 4096  }
 0x127   : > { %4117 = vsyncadd (%p5077_p5), %s479_s17, 4294963200  ;;  %s3043_s12 = sshll.u32 %s480_s11, 6  ;;  %s3044_s30 = sshll.u32 %s480_s11, 7 }
 0x128   : > { %s4596_s26 = scalar_lea.vmem [#allocation11], %s3043_s12  ;;  %s497_s5 = scalar_lea.sflag [#allocation13], %s478_s3 }
 0x129   : > { %s4598_s28 = scalar_lea.vmem [#allocation12], %s3044_s30 }
 0x12a   : > { %4119 = dma.done.wait (%p5077_p5), %s497_s5, 4096  }
 0x12b   : > { %4121 = vsyncadd (%p5077_p5), %s497_s5, 4294963200  ;;  %s3438_s9 = smul.u32 24, %s480_s11  ;;  %s4604_s20 = scalar_lea.vmem [#allocation14], %s3044_s30 }
 0x12c   : > { %s515_s24 = scalar_lea.sflag [#allocation16], %s478_s3 }
 0x12d   : > { %s4606_s18 = scalar_lea.vmem [#allocation15], %s3438_s9 }
 0x12e   : > { %4123 = dma.done.wait (%p5077_p5), %s515_s24, 384  }
 0x12f   : > { %4125 = vsyncadd (%p5077_p5), %s515_s24, 4294966912  ;;  %p5078_p11 = pmov %p5071_p0 }
 0x130   : > { %p5079_p13 = pmov %p5071_p0 }
 0x131   : > { %4127 = dma.done.wait (%p5078_p11), [#allocation16], 1024  }
 0x132   : > { %4129 = vsyncadd (%p5079_p13), [#allocation16], 4294966272  ;;  %s5080_s25 = sld [smem:[#allocation28_spill]] }
 0x138   : > { %p3047_p6 = scmp.ne.s32.totalorder %s5080_s25, 0 }
 0x139   : > { %v3576_v0 = vld [vmem:[#allocation8] sm:$0xff] (!%p3047_p6)   ;;  %v3577_v1 = vld [vmem:[#allocation8 + $0x8] sm:$0xff] (!%p3047_p6)   ;;  %v3578_v2 = vld [vmem:[#allocation8 + $0x10] sm:$0xff] (!%p3047_p6)  }
 0x13a   : > { %578 = sbr.rel (%p3047_p6) target bundleno = 881 (0x371), region = 96  ;;  %3257 = vmatprep.subr.bf16.mxu0 (!%p3047_p6), %v3576_v0  ;;  %v3579_v3 = vld [vmem:[#allocation8 + $0x18] sm:$0xff] (!%p3047_p6)   ;;  %v580_v5 = vld [vmem:[#allocation3 + $0x8] sm:$0xff] (!%p3047_p6)  ;;  %v3582_v9 = vld [vmem:[#allocation8 + $0x30] sm:$0xff] (!%p3047_p6)  }
 0x13b   : > { %3258 = vmatpush3.bf16.msra.mxu0 (!%p3047_p6), %v3576_v0  ;;  %v579_v4 = vld [vmem:[#allocation3] sm:$0xff] (!%p3047_p6)  ;;  %v3581_v8 = vld [vmem:[#allocation8 + $0x28] sm:$0xff] (!%p3047_p6)   ;;  %v582_v12 = vld [vmem:[#allocation3 + $0x18] sm:$0xff] (!%p3047_p6) }
 0x13c   : > { %3259 = vmatprep.subr.bf16.mxu0 (!%p3047_p6), %v3577_v1  ;;  %v583_v6 = vpack.c.bf16 (!%p3047_p6), %v580_v5, %v579_v4  ;;  %v3580_v7 = vld [vmem:[#allocation8 + $0x20] sm:$0xff] (!%p3047_p6)   ;;  %v3583_v10 = vld [vmem:[#allocation8 + $0x38] sm:$0xff] (!%p3047_p6)   ;;  %v581_v11 = vld [vmem:[#allocation3 + $0x10] sm:$0xff] (!%p3047_p6) }
 0x13d   : > { %v584_v13 = vpack.c.bf16 (!%p3047_p6), %v582_v12, %v581_v11  ;;  %v3048_v14 = vld [vmem:[#allocation6] ss:$0 sm:$0xff] (!%p3047_p6)  ;;  %v3057_v52 = vld [vmem:[#allocation6 + $0x1] ss:$0 sm:$0xff] (!%p3047_p6)  ;;  %v3058_v54 = vld [vmem:[#allocation6 + $0x2] ss:$0 sm:$0xff] (!%p3047_p6) }
 0x13e   : > { %3273 = vmatprep.mubr.bf16.mxu0 (!%p3047_p6), %v583_v6 }
 0x13f   : > { %3260 = vmatpush3.bf16.msra.mxu0 (!%p3047_p6), %v3577_v1 }
 0x140   : > { %3261 = vmatprep.subr.bf16.mxu0 (!%p3047_p6), %v3578_v2 }
 0x143   : > { %3262 = vmatpush3.bf16.msra.mxu0 %v3578_v2 }
 0x144   : > { %3263 = vmatprep.subr.bf16.mxu0 %v3579_v3 }
 0x147   : > { %3264 = vmatpush3.bf16.msra.mxu0 %v3579_v3 }
 0x148   : > { %3265 = vmatprep.subr.bf16.mxu0 %v3580_v7 }
 0x14b   : > { %3266 = vmatpush3.bf16.msra.mxu0 %v3580_v7 }
 0x14c   : > { %3267 = vmatprep.subr.bf16.mxu0 %v3581_v8 }
 0x14f   : > { %3268 = vmatpush3.bf16.msra.mxu0 %v3581_v8 }
 0x150   : > { %3269 = vmatprep.subr.bf16.mxu0 %v3582_v9 }
 0x153   : > { %3270 = vmatpush3.bf16.msra.mxu0 %v3582_v9 }
 0x154   : > { %3271 = vmatprep.subr.bf16.mxu0 %v3583_v10 }
 0x157   : > { %3272 = vmatpush3.bf16.msra.mxu0 %v3583_v10 }
 0x15a   : > { %3274 = vmatmul.mubr.bf16.vlgmr.msra.gmra.mrb[0].mxu0 %v584_v13 }
 0x22d   : > { %v3275_v15 = vpop.f32.mrb[0].mxu0 }
 0x22e   : > { %v697_v16 = vadd.f32 %v3275_v15, %v3048_v14  ;;  %v688_v17 = vpop.f32.mrb[1].mxu0 }
 0x22f   : > { %v689_v18 = vadd.f32 %v3048_v14, %v688_v17  ;;  %v3276_v19 = vpop.f32.mrb[2].mxu0 }
 0x230   : > { %709 = vadd.xlane.f32.xlu1 %v697_v16  ;;  %v691_v20 = vpop.f32.mrb[3].mxu0  ;;  %v700_v21 = vadd.f32 %v3276_v19, %v3048_v14 }
 0x231   : > { %705 = vadd.xlane.f32.xlu0 %v689_v18  ;;  %v692_v22 = vadd.f32 %v3048_v14, %v691_v20 }
 0x234   : > { %711 = vadd.xlane.f32.xlu1 %v700_v21 }
 0x235   : > { %707 = vadd.xlane.f32.xlu0 %v692_v22 }
 0x2bd   : > { %v710_v23 = vpop.xlane.xlu1 %709 }
 0x2be   : > { %v706_v24 = vpop.xlane.xlu0 %705  ;;  %v716_v25 = vmul.f32 0.0078125, %v710_v23 }
 0x2bf   : > { %v714_v26 = vmul.f32 0.0078125, %v706_v24 }
 0x2c0   : > { %v720_v30 = vsub.f32 %v697_v16, %v716_v25 }
 0x2c1   : > { %v718_v27 = vsub.f32 %v689_v18, %v714_v26  ;;  %v712_v28 = vpop.xlane.xlu1 %711 }
 0x2c2   : > { %v708_v29 = vpop.xlane.xlu0 %707  ;;  %v717_v31 = vmul.f32 0.0078125, %v712_v28  ;;  %v724_v36 = vmul.f32 %v720_v30, %v720_v30 }
 0x2c3   : > { %v715_v32 = vmul.f32 0.0078125, %v708_v29  ;;  %v722_v33 = vmul.f32 %v718_v27, %v718_v27 }
 0x2c4   : > { %v721_v35 = vsub.f32 %v700_v21, %v717_v31 }
 0x2c5   : > { %v719_v34 = vsub.f32 %v692_v22, %v715_v32  ;;  %726 = vadd.xlane.f32.xlu0 %v722_v33 }
 0x2c6   : > { %v725_v38 = vmul.f32 %v721_v35, %v721_v35 }
 0x2c7   : > { %v723_v37 = vmul.f32 %v719_v34, %v719_v34 }
 0x2c9   : > { %730 = vadd.xlane.f32.xlu0 %v724_v36  ;;  %728 = vadd.xlane.f32.xlu1 %v723_v37 }
 0x2cd   : > { %732 = vadd.xlane.f32.xlu1 %v725_v38 }
 0x352   : > { %v727_v39 = vpop.xlane.xlu0 %726 }
 0x353   : > { %v734_v40 = vmul.f32 0.0078125, %v727_v39 }
 0x355   : > { %v738_v41 = vadd.f32 1e-05, %v734_v40 }
 0x356   : > { %v729_v42 = vpop.xlane.xlu1 %728  ;;  %v731_v43 = vpop.xlane.xlu0 %730 }
 0x357   : > { %3584 = vrsqrt.f32 %v738_v41  ;;  %v735_v44 = vmul.f32 0.0078125, %v729_v42  ;;  %v736_v45 = vmul.f32 0.0078125, %v731_v43 }
 0x359   : > { %v739_v46 = vadd.f32 1e-05, %v735_v44  ;;  %v740_v47 = vadd.f32 1e-05, %v736_v45 }
 0x35a   : > { %v733_v48 = vpop.xlane.xlu1 %732 }
 0x35b   : > { %3586 = vrsqrt.f32 %v739_v46  ;;  %v737_v49 = vmul.f32 0.0078125, %v733_v48 }
 0x35c   : > { %3588 = vrsqrt.f32 %v740_v47 }
 0x35d   : > { %v741_v50 = vadd.f32 1e-05, %v737_v49 }
 0x35f   : > { %3590 = vrsqrt.f32 %v741_v50 }
 0x361   : > { %v3585_v51 = vpop.eup %3584 }
 0x362   : > { %v746_v53 = vmul.f32 %v3585_v51, %v718_v27 }
 0x364   : > { %v754_v55 = vmul.f32 %v3057_v52, %v746_v53 }
 0x365   : > { %v3587_v56 = vpop.eup %3586 }
 0x366   : > { %v3589_v57 = vpop.eup %3588  ;;  %v762_v58 = vadd.f32 %v3058_v54, %v754_v55  ;;  %v747_v59 = vmul.f32 %v3587_v56, %v719_v34 }
 0x367   : > { %v748_v60 = vmul.f32 %v3589_v57, %v720_v30 }
 0x368   : > { %766 = vst [vmem:[#allocation2] sm:$0xff] %v762_v58  ;;  %v755_v61 = vmul.f32 %v3057_v52, %v747_v59 }
 0x369   : > { %v3591_v62 = vpop.eup %3590  ;;  %v756_v63 = vmul.f32 %v3057_v52, %v748_v60 }
 0x36a   : > { %v763_v0 = vadd.f32 %v3058_v54, %v755_v61  ;;  %v749_v1 = vmul.f32 %v3591_v62, %v721_v35 }
 0x36b   : > { %v764_v2 = vadd.f32 %v3058_v54, %v756_v63 }
 0x36c   : > { %767 = vst [vmem:[#allocation2 + $0x8] sm:$0xff] %v763_v0  ;;  %v757_v3 = vmul.f32 %v3057_v52, %v749_v1 }
 0x36d   : > { %768 = vst [vmem:[#allocation2 + $0x10] sm:$0xff] %v764_v2 }
 0x36e   : > { %v765_v4 = vadd.f32 %v3058_v54, %v757_v3 }
 0x370   : > { %769 = vst [vmem:[#allocation2 + $0x18] sm:$0xff] %v765_v4 }
 0x371 PF: > { %v3622_v5 = vld [vmem:[%s4590_s10 + $0x4] ss:$12 sps:$4 sm:$0xff]   ;;  %v3624_v6 = vld [vmem:[%s4590_s10] ss:$12 sps:$4 sm:$0xff]   ;;  %v4173_v7 = vmov 0   ;;  %v4174_v28 = vmov 0.0   ;;  %v810_v29 = vlaneseq }
 0x372   : > { %985 = vmatprep.mubr.bf16.mxu0 %v4173_v7  ;;  %953 = vmatprep.subr.bf16.mxu0 %v3622_v5  ;;  %v3625_v8 = vld [vmem:[%s4590_s10 + $0x1c] ss:$12 sps:$4 sm:$0xff]   ;;  %v3627_v9 = vld [vmem:[%s4590_s10 + $0x18] ss:$12 sps:$4 sm:$0xff]   ;;  %v3628_v10 = vld [vmem:[%s4590_s10 + $0x34] ss:$12 sps:$4 sm:$0xff]  }
 0x373   : > { %954 = vmatpush1.bf16.msra.mxu0 %v3624_v6  ;;  %v3630_v11 = vld [vmem:[%s4590_s10 + $0x30] ss:$12 sps:$4 sm:$0xff]   ;;  %v3631_v12 = vld [vmem:[%s4590_s10 + $0x4c] ss:$12 sps:$4 sm:$0xff]   ;;  %v3633_v14 = vld [vmem:[%s4590_s10 + $0x48] ss:$12 sps:$4 sm:$0xff]  }
 0x374   : > { %955 = vmatprep.subr.bf16.mxu0 %v3625_v8  ;;  %v770_v13 = vld [vmem:[#allocation2] sm:$0xff]  ;;  %v771_v15 = vld [vmem:[#allocation2 + $0x8] sm:$0xff]  ;;  %v3643_v23 = vld [vmem:[%s4590_s10 + $0xac] ss:$12 sps:$4 sm:$0xff]   ;;  %vm4175_vm0 = vmmov 0   ;;  %v4641_v30 = vshrl.u32 %v810_v29, 7 }
 0x375   : > { %v3634_v16 = vld [vmem:[%s4590_s10 + $0x64] ss:$12 sps:$4 sm:$0xff]   ;;  %v774_v17 = vpack.c.bf16 %v771_v15, %v770_v13  ;;  %v3636_v18 = vld [vmem:[%s4590_s10 + $0x60] ss:$12 sps:$4 sm:$0xff]   ;;  %v3637_v19 = vld [vmem:[%s4590_s10 + $0x7c] ss:$12 sps:$4 sm:$0xff]  }
 0x376   : > { %v3639_v20 = vld [vmem:[%s4590_s10 + $0x78] ss:$12 sps:$4 sm:$0xff]   ;;  %v3640_v21 = vld [vmem:[%s4590_s10 + $0x94] ss:$12 sps:$4 sm:$0xff]   ;;  %v3642_v22 = vld [vmem:[%s4590_s10 + $0x90] ss:$12 sps:$4 sm:$0xff]  }
 0x377   : > { %956 = vmatpush1.bf16.msra.mxu0 %v3627_v9  ;;  %3293 = vmatprep.mubr.bf16.mxu1 %v774_v17  ;;  %v3645_v24 = vld [vmem:[%s4590_s10 + $0xa8] ss:$12 sps:$4 sm:$0xff]   ;;  %v772_v25 = vld [vmem:[#allocation2 + $0x10] sm:$0xff]  ;;  %v812_v31 = vsub.s32 0, %v4641_v30  ;;  %v816_v33 = vsub.s32 1, %v4641_v30  ;;  %vm1061_vm1 = vcmask 261120  }
 0x378   : > { %957 = vmatprep.subr.bf16.mxu0 %v3628_v10  ;;  %v773_v26 = vld [vmem:[#allocation2 + $0x18] sm:$0xff]  ;;  %v3647_v59 = vld [vmem:[%s4590_s10 + $0x20] ss:$12 sps:$4 sm:$0xff]   ;;  %v3649_v61 = vld [vmem:[%s4590_s10 + $0x50] ss:$12 sps:$4 sm:$0xff]   ;;  %vm1160_vm2 = vcmask 130048  }
 0x379   : > { %v4635_v27 = vpack.c.bf16 %v773_v26, %v772_v25  ;;  %v4645_v32 = vld [vmem:[%s4606_s18] ss:$8 sm:$0x7]  ;;  %s4176_s8 = smov 96   ;;  %s4177_s23 = smov 64   ;;  %vm2091_vm3 = vcmask 523264  }
 0x37a   : > { %v813_v34 = vrot.slane %v4645_v32, %v812_v31  ;;  %v817_v36 = vrot.slane %v4645_v32, %v816_v33  ;;  %v3646_v58 = vld [vmem:[%s4590_s10 + $0x8] ss:$12 sps:$4 sm:$0xff]   ;;  %v3648_v60 = vld [vmem:[%s4590_s10 + $0x38] ss:$12 sps:$4 sm:$0xff]   ;;  %v3651_v63 = vld [vmem:[%s4590_s10 + $0x80] ss:$12 sps:$4 sm:$0xff]  }
 0x37b   : > { %958 = vmatpush1.bf16.msra.mxu0 %v3630_v11  ;;  %3277 = vmatprep.subr.bf16.mxu1 %v3646_v58  ;;  %v3650_v62 = vld [vmem:[%s4590_s10 + $0x68] ss:$12 sps:$4 sm:$0xff]   ;;  %v3652_v0 = vld [vmem:[%s4590_s10 + $0x98] ss:$12 sps:$4 sm:$0xff]   ;;  %v3653_v1 = vld [vmem:[%s4590_s10 + $0xb0] ss:$12 sps:$4 sm:$0xff]  }
 0x37c   : > { %959 = vmatprep.subr.bf16.mxu0 %v3631_v12  ;;  %3278 = vmatpush3.bf16.msra.mxu1 %v3646_v58  ;;  %s4178_s14 = smov 32   ;;  %vm2096_vm4 = vcmask 785408   ;;  %s5081_s29 = sld [smem:[#allocation28_spill]] }
 0x37d   : > { %3279 = vmatprep.subr.bf16.mxu1 %v3647_v59 }
 0x37f   : > { %960 = vmatpush1.bf16.msra.mxu0 %v3633_v14 }
 0x380   : > { %961 = vmatprep.subr.bf16.mxu0 %v3634_v16  ;;  %3280 = vmatpush3.bf16.msra.mxu1 %v3647_v59 }
 0x381   : > { %3281 = vmatprep.subr.bf16.mxu1 %v3648_v60 }
 0x382   : > { %p3140_p8 = scmp.ne.s32.totalorder %s5081_s29, 1 }
 0x383   : > { %962 = vmatpush1.bf16.msra.mxu0 %v3636_v18 }
 0x384   : > { %963 = vmatprep.subr.bf16.mxu0 %v3637_v19  ;;  %3282 = vmatpush3.bf16.msra.mxu1 %v3648_v60 }
 0x385   : > { %3283 = vmatprep.subr.bf16.mxu1 %v3649_v61 }
 0x387   : > { %964 = vmatpush1.bf16.msra.mxu0 %v3639_v20 }
 0x388   : > { %965 = vmatprep.subr.bf16.mxu0 %v3640_v21  ;;  %3284 = vmatpush3.bf16.msra.mxu1 %v3649_v61 }
 0x389   : > { %3285 = vmatprep.subr.bf16.mxu1 %v3650_v62 }
 0x38b   : > { %966 = vmatpush1.bf16.msra.mxu0 %v3642_v22 }
 0x38c   : > { %967 = vmatprep.subr.bf16.mxu0 %v3643_v23  ;;  %3286 = vmatpush3.bf16.msra.mxu1 %v3650_v62 }
 0x38d   : > { %3287 = vmatprep.subr.bf16.mxu1 %v3651_v63 }
 0x38f   : > { %968 = vmatpush1.bf16.msra.mxu0 %v3645_v24 }
 0x390   : > { %3297 = vmatprep.subr.bf16.mxu0 %v4174_v28  ;;  %3288 = vmatpush3.bf16.msra.mxu1 %v3651_v63 }
 0x391   : > { %3289 = vmatprep.subr.bf16.mxu1 %v3652_v0 }
 0x392   : > { %986 = vmatmul.mubr.bf16.vlgmr.msra.gmra.mrb[0].mxu0 %v774_v17 }
 0x393   : > { %995 = vmatprep.mubr.bf16.mxu0 %v4173_v7 }
 0x394   : > { %3290 = vmatpush3.bf16.msra.mxu1 %v3652_v0 }
 0x395   : > { %3291 = vmatprep.subr.bf16.mxu1 %v3653_v1 }
 0x398   : > { %3292 = vmatpush3.bf16.msra.mxu1 %v3653_v1 }
 0x399   : > { %3309 = vmatprep.subr.bf16.mxu1 %v4174_v28 }
 0x39a   : > { %996 = vmatmul.mubr.bf16.gmra.mrb[4].mxu0 %v4635_v27 }
 0x39b   : > { %3299 = vmatprep.mubr.msk.bf16.mxu0 %vm4175_vm0, %v4174_v28  ;;  %3294 = vmatmul.mubr.bf16.vlgmr.msra.gmra.mrb[0].mxu1 %v4635_v27 }
 0x39c   : > { %3311 = vmatprep.mubr.msk.bf16.mxu1 %vm4175_vm0, %v4174_v28 }
 0x465   : > { %v987_v35 = vpop.f32.mrb[0].mxu0 }
 0x466   : > { %v989_v37 = vpop.f32.mrb[1].mxu0  ;;  %v988_v39 = vadd.f32 %v987_v35, %v813_v34 }
 0x467   : > { %v991_v38 = vpop.f32.mrb[2].mxu0  ;;  %v990_v42 = vadd.f32 %v989_v37, %v817_v36 }
 0x468   : > { %v992_v40 = vadd.f32 %v991_v38, %v813_v34  ;;  %v993_v41 = vpop.f32.mrb[3].mxu0 }
 0x469   : > { %v994_v43 = vadd.f32 %v993_v41, %v817_v36 }
 0x46a   : > { %v4654_v44 = vpack.c.bf16 %v992_v40, %v988_v39  ;;  %v820_v39 = vsub.s32 2, %v4641_v30 }
 0x46b   : > { %v4656_v45 = vpack.c.bf16 %v994_v43, %v990_v42 }
 0x46c   : > { %v821_v42 = vrot.slane %v4645_v32, %v820_v39 }
 0x46d   : > { %v997_v46 = vpop.f32.mrb[4].mxu0  ;;  %v1066_v47 = vsel %vm1061_vm1, %v4656_v45, 0 }
 0x46e   : > { %v998_v48 = vadd.f32 %v997_v46, %v813_v34  ;;  %v999_v49 = vpop.f32.mrb[5].mxu0  ;;  %3298 = vmatpush3.bf16.xpose.msra.mxu0 %v1066_v47  ;;  %v3295_v40 = vpop.f32.mrb[0].mxu1 }
 0x46f   : > { %v1000_v50 = vadd.f32 %v999_v49, %v817_v36  ;;  %v1001_v51 = vpop.f32.mrb[6].mxu0  ;;  %3303 = vmatprep.subr.bf16.mxu0 %v4174_v28  ;;  %v1040_v41 = vpop.f32.mrb[1].mxu1 }
 0x470   : > { %v1002_v52 = vadd.f32 %v1001_v51, %v813_v34  ;;  %v1003_v53 = vpop.f32.mrb[7].mxu0  ;;  %v3296_v43 = vpop.f32.mrb[2].mxu1  ;;  %v1041_v47 = vadd.f32 %v1040_v41, %v821_v42 }
 0x471   : > { %v1004_v54 = vadd.f32 %v1003_v53, %v817_v36  ;;  %v1043_v46 = vpop.f32.mrb[3].mxu1  ;;  %v1052_v51 = vadd.f32 %v3296_v43, %v821_v42 }
 0x472   : > { %v4661_v55 = vpack.c.bf16 %v1002_v52, %v998_v48  ;;  %v1044_v48 = vadd.f32 %v1043_v46, %v821_v42 }
 0x473   : > { %v4663_v56 = vpack.c.bf16 %v1004_v54, %v1000_v50  ;;  %v1049_v50 = vadd.f32 %v3295_v40, %v821_v42 }
 0x474   : > { %v4699_v49 = vpack.c.bf16 %v1044_v48, %v1041_v47 }
 0x475   : > { %3300 = vmatmul.mubr.msk.bf16.vlgmr.msra.gmra.mrb[8].mxu0 %vm1061_vm1, %v4654_v44  ;;  %v1113_v57 = vsel %vm1061_vm1, %v4663_v56, 0  ;;  %v4705_v32 = vpack.c.bf16 %v1052_v51, %v1049_v50 }
 0x476   : > { %3304 = vmatpush3.bf16.xpose.msra.mxu0 %v1113_v57  ;;  %3305 = vmatprep.mubr.msk.bf16.mxu0 %vm4175_vm0, %v4174_v28 }
 0x477   : > { %3315 = vmatprep.subr.bf16.mxu0 %v4174_v28  ;;  %3310 = vmatpush3.bf16.msra.mxu1 %v4699_v49 }
 0x478   : > { %3321 = vmatprep.subr.bf16.mxu1 %v4174_v28 }
 0x47d   : > { %3306 = vmatmul.mubr.msk.bf16.vlgmr.msra.gmra.mrb[12].mxu0 %vm1061_vm1, %v4661_v55 }
 0x47e   : > { %3317 = vmatprep.mubr.msk.bf16.mxu0 %vm4175_vm0, %v4174_v28  ;;  %3316 = vmatpush3.bf16.msra.mxu0 %v4705_v32 }
 0x47f   : > { %3327 = vmatprep.subr.bf16.mxu0 %v4174_v28 }
 0x548   : > { %v1102_v2 = vpop.f32.mrb[8].mxu0 }
 0x549   : > { %v1156_v3 = vmul.f32 0.17677669, %v1102_v2  ;;  %v3301_v4 = vpop.f32.mrb[9].mxu0 }
 0x54a   : > { %v1105_v5 = vpop.f32.mrb[10].mxu0 }
 0x54b   : > { %v1157_v6 = vmul.f32 0.17677669, %v1105_v5  ;;  %v3302_v8 = vpop.f32.mrb[11].mxu0  ;;  %v1161_v9 = vsel %vm1160_vm2, %v1156_v3, -inf }
 0x54c   : > { %1162 = vmax.xlane.f32.xlu0 %v1161_v9 }
 0x54d   : > { %v1164_v10 = vsel %vm1160_vm2, %v1157_v6, -inf }
 0x550   : > { %1165 = vmax.xlane.f32.xlu0 %v1164_v10  ;;  %v1149_v11 = vpop.f32.mrb[12].mxu0 }
 0x551   : > { %v1158_v12 = vmul.f32 0.17677669, %v1149_v11  ;;  %v3307_v13 = vpop.f32.mrb[13].mxu0 }
 0x552   : > { %v1152_v14 = vpop.f32.mrb[14].mxu0 }
 0x553   : > { %v1167_v15 = vsel %vm1160_vm2, %v1158_v12, -inf  ;;  %v1159_v16 = vmul.f32 0.17677669, %v1152_v14  ;;  %v3308_v17 = vpop.f32.mrb[15].mxu0 }
 0x554   : > { %1168 = vmax.xlane.f32.xlu1 %v1167_v15 }
 0x555   : > { %v1170_v18 = vsel %vm1160_vm2, %v1159_v16, -inf }
 0x558   : > { %1171 = vmax.xlane.f32.xlu1 %v1170_v18 }
 0x5d9   : > { %v1163_v19 = vpop.xlane.xlu0 %1162 }
 0x5da   : > { %v1173_v20 = vsub.f32 %v1156_v3, %v1163_v19 }
 0x5dc   : > { %v1177_v21 = vmul.f32 1.442695, %v1173_v20 }
 0x5dd   : > { %v1166_v22 = vpop.xlane.xlu0 %1165 }
 0x5de   : > { %3702 = vpow2.f32 %v1177_v21  ;;  %v1174_v23 = vsub.f32 %v1157_v6, %v1166_v22 }
 0x5e0   : > { %v1179_v24 = vmul.f32 1.442695, %v1174_v23 }
 0x5e1   : > { %v1169_v25 = vpop.xlane.xlu1 %1168 }
 0x5e2   : > { %3704 = vpow2.f32 %v1179_v24  ;;  %v1175_v26 = vsub.f32 %v1158_v12, %v1169_v25 }
 0x5e4   : > { %v1181_v27 = vmul.f32 1.442695, %v1175_v26 }
 0x5e5   : > { %v1172_v52 = vpop.xlane.xlu1 %1171 }
 0x5e6   : > { %3706 = vpow2.f32 %v1181_v27  ;;  %v1176_v53 = vsub.f32 %v1159_v16, %v1172_v52 }
 0x5e8   : > { %v3703_v29 = vpop.eup %3702  ;;  %v1183_v54 = vmul.f32 1.442695, %v1176_v53 }
 0x5e9   : > { %v1185_v34 = vsel %vm1160_vm2, %v3703_v29, 0.0 }
 0x5ea   : > { %1186 = vadd.xlane.f32.xlu0 %v1185_v34  ;;  %3708 = vpow2.f32 %v1183_v54 }
 0x5ec   : > { %v3705_v35 = vpop.eup %3704 }
 0x5ed   : > { %v1188_v36 = vsel %vm1160_vm2, %v3705_v35, 0.0 }
 0x5ee   : > { %1189 = vadd.xlane.f32.xlu1 %v1188_v36 }
 0x5f0   : > { %v3707_v37 = vpop.eup %3706 }
 0x5f1   : > { %v1191_v38 = vsel %vm1160_vm2, %v3707_v37, 0.0 }
 0x5f2   : > { %1192 = vadd.xlane.f32.xlu0 %v1191_v38 }
 0x5f4   : > { %v3709_v57 = vpop.eup %3708 }
 0x5f5   : > { %v1194_v58 = vsel %vm1160_vm2, %v3709_v57, 0.0 }
 0x5ff   : > { %1352 = vrot.lane.b32.xlu1 %v4663_v56, %s4176_s8 }
 0x608   : > { %1299 = vrot.lane.b32.xlu0 %v4656_v45, %s4176_s8 }
 0x623   : > { %1195 = vadd.xlane.f32.xlu1 %v1194_v58 }
 0x634   : > { %1296 = vrot.lane.b32.xlu1 %v4654_v44, %s4176_s8 }
 0x638   : > { %1349 = vrot.lane.b32.xlu1 %v4661_v55, %s4176_s8 }
 0x677   : > { %v1187_v59 = vpop.xlane.xlu0 %1186 }
 0x678   : > { %3710 = vrcp.f32 %v1187_v59 }
 0x67b   : > { %v1190_v60 = vpop.xlane.xlu1 %1189 }
 0x67c   : > { %3712 = vrcp.f32 %v1190_v60 }
 0x67f   : > { %v1193_v61 = vpop.xlane.xlu0 %1192  ;;  %v1353_v5 = vpop.permute.xlu1 %1352 }
 0x680   : > { %3714 = vrcp.f32 %v1193_v61  ;;  %v1358_v14 = vsel %vm1061_vm1, %v1353_v5, 0 }
 0x682   : > { %v3711_v62 = vpop.eup %3710 }
 0x683   : > { %v1198_v0 = vmul.f32 %v3711_v62, %v3703_v29  ;;  %v1300_v2 = vpop.permute.xlu0 %1299 }
 0x684   : > { %v1305_v4 = vsel %vm1061_vm1, %v1300_v2, 0 }
 0x686   : > { %v3713_v63 = vpop.eup %3712 }
 0x687   : > { %v1200_v1 = vmul.f32 %v3713_v63, %v3705_v35 }
 0x689   : > { %v1205_v3 = vpack.c.bf16 %v1200_v1, %v1198_v0 }
 0x68a   : > { %v3715_v9 = vpop.eup %3714 }
 0x68b   : > { %3312 = vmatmul.mubr.msk.bf16.vlgmr.msra.gmra.mrb[4].mxu1 %vm1160_vm2, %v1205_v3  ;;  %v1202_v11 = vmul.f32 %v3715_v9, %v3707_v37 }
 0x68c   : > { %3322 = vmatpush3.bf16.xpose.msra.mxu1 %v1305_v4  ;;  %3323 = vmatprep.mubr.msk.bf16.mxu1 %vm4175_vm0, %v4174_v28 }
 0x68d   : > { %3333 = vmatprep.subr.bf16.mxu1 %v4174_v28 }
 0x6b0   : > { %v1196_v6 = vpop.xlane.xlu1 %1195 }
 0x6b1   : > { %3716 = vrcp.f32 %v1196_v6 }
 0x6b4   : > { %v1297_v8 = vpop.permute.xlu1 %1296 }
 0x6b5   : > { %3324 = vmatmul.mubr.msk.bf16.vlgmr.msra.gmra.mrb[8].mxu1 %vm1061_vm1, %v1297_v8 }
 0x6b6   : > { %3335 = vmatprep.mubr.msk.bf16.mxu1 %vm4175_vm0, %v4174_v28 }
 0x6b8   : > { %v1350_v15 = vpop.permute.xlu1 %1349 }
 0x6bb   : > { %v3717_v10 = vpop.eup %3716 }
 0x6bc   : > { %v1204_v12 = vmul.f32 %v3717_v10, %v3709_v57 }
 0x6be   : > { %v1206_v13 = vpack.c.bf16 %v1204_v12, %v1202_v11 }
 0x6c0   : > { %3318 = vmatmul.mubr.msk.bf16.vlgmr.msra.gmra.mrb[16].mxu0 %vm1160_vm2, %v1206_v13 }
 0x6c1   : > { %3328 = vmatpush3.bf16.xpose.msra.mxu0 %v1358_v14  ;;  %3329 = vmatprep.mubr.msk.bf16.mxu0 %vm4175_vm0, %v4174_v28 }
 0x6c2   : > { %3339 = vmatprep.subr.bf16.mxu0 %v4174_v28 }
 0x6c8   : > { %3330 = vmatmul.mubr.msk.bf16.vlgmr.msra.gmra.mrb[20].mxu0 %vm1061_vm1, %v1350_v15 }
 0x6c9   : > { %3341 = vmatprep.mubr.msk.bf16.mxu0 %vm4175_vm0, %v4174_v28 }
 0x75e   : > { %v4730_v16 = vpop.f32.mrb[4].mxu1 }
 0x75f   : > { %v3313_v17 = vpop.f32.mrb[5].mxu1 }
 0x760   : > { %v4732_v18 = vpop.f32.mrb[6].mxu1 }
 0x761   : > { %v3314_v19 = vpop.f32.mrb[7].mxu1 }
 0x788   : > { %v1341_v20 = vpop.f32.mrb[8].mxu1 }
 0x789   : > { %v1401_v21 = vmul.f32 0.17677669, %v1341_v20  ;;  %v3325_v22 = vpop.f32.mrb[9].mxu1 }
 0x78a   : > { %v1344_v23 = vpop.f32.mrb[10].mxu1 }
 0x78b   : > { %v1402_v24 = vmul.f32 0.17677669, %v1344_v23  ;;  %v3326_v25 = vpop.f32.mrb[11].mxu1  ;;  %v1405_v26 = vsel %vm1160_vm2, %v1401_v21, -inf }
 0x78c   : > { %1406 = vmax.xlane.f32.xlu0 %v1405_v26 }
 0x78d   : > { %v1408_v27 = vsel %vm1160_vm2, %v1402_v24, -inf }
 0x78e   : > { %1409 = vmax.xlane.f32.xlu1 %v1408_v27 }
 0x793   : > { %v4736_v29 = vpop.f32.mrb[16].mxu0 }
 0x794   : > { %v3319_v34 = vpop.f32.mrb[17].mxu0 }
 0x795   : > { %v4738_v35 = vpop.f32.mrb[18].mxu0 }
 0x796   : > { %v3320_v36 = vpop.f32.mrb[19].mxu0 }
 0x79b   : > { %v1394_v37 = vpop.f32.mrb[20].mxu0 }
 0x79c   : > { %v1403_v38 = vmul.f32 0.17677669, %v1394_v37  ;;  %v3331_v39 = vpop.f32.mrb[21].mxu0 }
 0x79d   : > { %v1397_v40 = vpop.f32.mrb[22].mxu0 }
 0x79e   : > { %v1404_v41 = vmul.f32 0.17677669, %v1397_v40  ;;  %v3332_v42 = vpop.f32.mrb[23].mxu0  ;;  %v1411_v43 = vsel %vm1160_vm2, %v1403_v38, -inf }
 0x79f   : > { %1412 = vmax.xlane.f32.xlu0 %v1411_v43 }
 0x7a0   : > { %v1414_v46 = vsel %vm1160_vm2, %v1404_v41, -inf }
 0x7a3   : > { %1415 = vmax.xlane.f32.xlu0 %v1414_v46 }
 0x819   : > { %v1407_v47 = vpop.xlane.xlu0 %1406 }
 0x81a   : > { %v1417_v48 = vsub.f32 %v1401_v21, %v1407_v47 }
 0x81b   : > { %v1410_v50 = vpop.xlane.xlu1 %1409 }
 0x81c   : > { %v1421_v51 = vmul.f32 1.442695, %v1417_v48  ;;  %v1418_v52 = vsub.f32 %v1402_v24, %v1410_v50 }
 0x81e   : > { %3718 = vpow2.f32 %v1421_v51  ;;  %v1423_v53 = vmul.f32 1.442695, %v1418_v52 }
 0x820   : > { %3720 = vpow2.f32 %v1423_v53 }
 0x828   : > { %v3719_v54 = vpop.eup %3718 }
 0x829   : > { %v1429_v57 = vsel %vm1160_vm2, %v3719_v54, 0.0 }
 0x82a   : > { %v3721_v58 = vpop.eup %3720  ;;  %1430 = vadd.xlane.f32.xlu0 %v1429_v57 }
 0x82b   : > { %v1432_v59 = vsel %vm1160_vm2, %v3721_v58, 0.0 }
 0x82c   : > { %1433 = vadd.xlane.f32.xlu1 %v1432_v59  ;;  %v1413_v60 = vpop.xlane.xlu0 %1412 }
 0x82d   : > { %v1419_v61 = vsub.f32 %v1403_v38, %v1413_v60 }
 0x82f   : > { %v1425_v62 = vmul.f32 1.442695, %v1419_v61 }
 0x830   : > { %v1416_v1 = vpop.xlane.xlu0 %1415 }
 0x831   : > { %3722 = vpow2.f32 %v1425_v62  ;;  %v1420_v2 = vsub.f32 %v1404_v41, %v1416_v1 }
 0x833   : > { %v1427_v3 = vmul.f32 1.442695, %v1420_v2 }
 0x835   : > { %3724 = vpow2.f32 %v1427_v3 }
 0x83b   : > { %v3723_v63 = vpop.eup %3722 }
 0x83c   : > { %v1435_v0 = vsel %vm1160_vm2, %v3723_v63, 0.0 }
 0x83d   : > { %1500 = vrot.lane.b32.xlu1 %v4705_v32, %s4176_s8  ;;  %1436 = vadd.xlane.f32.xlu0 %v1435_v0 }
 0x83f   : > { %v3725_v4 = vpop.eup %3724 }
 0x840   : > { %v1438_v5 = vsel %vm1160_vm2, %v3725_v4, 0.0 }
 0x841   : > { %1549 = vrot.lane.b32.xlu1 %v4656_v45, %s4177_s23 }
 0x853   : > { %1452 = vrot.lane.b32.xlu0 %v4699_v49, %s4176_s8 }
 0x857   : > { %1547 = vrot.lane.b32.xlu0 %v4654_v44, %s4177_s23 }
 0x865   : > { %1439 = vadd.xlane.f32.xlu1 %v1438_v5 }
 0x876   : > { %1600 = vrot.lane.b32.xlu1 %v4663_v56, %s4177_s23 }
 0x87a   : > { %1598 = vrot.lane.b32.xlu1 %v4661_v55, %s4177_s23 }
 0x8b7   : > { %v1431_v9 = vpop.xlane.xlu0 %1430 }
 0x8b9   : > { %v1434_v6 = vpop.xlane.xlu1 %1433 }
 0x8ba   : > { %3726 = vrcp.f32 %v1434_v6 }
 0x8bb   : > { %3728 = vrcp.f32 %v1431_v9 }
 0x8bd   : > { %v1501_v8 = vpop.permute.xlu1 %1500 }
 0x8be   : > { %3340 = vmatpush3.bf16.msra.mxu0 %v1501_v8 }
 0x8bf   : > { %3351 = vmatprep.subr.bf16.mxu0 %v4174_v28 }
 0x8c1   : > { %v1550_v19 = vpop.permute.xlu1 %1549 }
 0x8c2   : > { %v1555_v20 = vsel %vm1061_vm1, %v1550_v19, 0 }
 0x8c4   : > { %v3727_v10 = vpop.eup %3726 }
 0x8c5   : > { %v3729_v12 = vpop.eup %3728  ;;  %v1444_v13 = vmul.f32 %v3727_v10, %v3721_v58 }
 0x8c6   : > { %v1442_v14 = vmul.f32 %v3729_v12, %v3719_v54 }
 0x8c8   : > { %v1449_v17 = vpack.c.bf16 %v1444_v13, %v1442_v14 }
 0x8ca   : > { %v1437_v11 = vpop.xlane.xlu0 %1436 }
 0x8cb   : > { %3730 = vrcp.f32 %v1437_v11 }
 0x8ce   : > { %v1453_v15 = vpop.permute.xlu0 %1452 }
 0x8cf   : > { %3334 = vmatpush3.bf16.msra.mxu1 %v1453_v15 }
 0x8d0   : > { %3345 = vmatprep.subr.bf16.mxu1 %v4174_v28 }
 0x8d2   : > { %3336 = vmatmul.mubr.msk.bf16.vlgmr.msra.gmra.mrb[12].mxu1 %vm1160_vm2, %v1449_v17  ;;  %v1548_v21 = vpop.permute.xlu0 %1547 }
 0x8d3   : > { %3347 = vmatprep.mubr.msk.bf16.mxu1 %vm4175_vm0, %v4174_v28 }
 0x8d5   : > { %v3731_v23 = vpop.eup %3730 }
 0x8d6   : > { %v1446_v25 = vmul.f32 %v3731_v23, %v3723_v63 }
 0x8d8   : > { %3346 = vmatpush3.bf16.xpose.msra.mxu1 %v1555_v20 }
 0x8d9   : > { %3357 = vmatprep.subr.bf16.mxu1 %v4174_v28 }
 0x8df   : > { %3348 = vmatmul.mubr.msk.bf16.vlgmr.msra.gmra.mrb[16].mxu1 %vm1061_vm1, %v1548_v21 }
 0x8e0   : > { %3359 = vmatprep.mubr.msk.bf16.mxu1 %vm4175_vm0, %v4174_v28 }
 0x8f2   : > { %v1440_v22 = vpop.xlane.xlu1 %1439 }
 0x8f3   : > { %3732 = vrcp.f32 %v1440_v22 }
 0x8f6   : > { %v1601_v27 = vpop.permute.xlu1 %1600 }
 0x8f7   : > { %v1606_v36 = vsel %vm1061_vm1, %v1601_v27, 0 }
 0x8fa   : > { %v1599_v37 = vpop.permute.xlu1 %1598 }
 0x8fd   : > { %v3733_v24 = vpop.eup %3732 }
 0x8fe   : > { %v1448_v26 = vmul.f32 %v3733_v24, %v3725_v4 }
 0x900   : > { %v1450_v34 = vpack.c.bf16 %v1448_v26, %v1446_v25 }
 0x902   : > { %3342 = vmatmul.mubr.msk.bf16.vlgmr.msra.gmra.mrb[24].mxu0 %vm1160_vm2, %v1450_v34 }
 0x903   : > { %3352 = vmatpush3.bf16.xpose.msra.mxu0 %v1606_v36  ;;  %3353 = vmatprep.mubr.msk.bf16.mxu0 %vm4175_vm0, %v4174_v28 }
 0x904   : > { %3363 = vmatprep.subr.bf16.mxu0 %v4174_v28 }
 0x90a   : > { %3354 = vmatmul.mubr.msk.bf16.vlgmr.msra.gmra.mrb[28].mxu0 %vm1061_vm1, %v1599_v37 }
 0x90b   : > { %3365 = vmatprep.mubr.msk.bf16.mxu0 %vm4175_vm0, %v4174_v28 }
 0x9a5   : > { %v4776_v38 = vpop.f32.mrb[12].mxu1 }
 0x9a6   : > { %v3337_v39 = vpop.f32.mrb[13].mxu1 }
 0x9a7   : > { %v4778_v40 = vpop.f32.mrb[14].mxu1 }
 0x9a8   : > { %v3592_v41 = vpack.i.bf16 %v4778_v40, %v4776_v38  ;;  %v3338_v42 = vpop.f32.mrb[15].mxu1 }
 0x9b2   : > { %v1591_v43 = vpop.f32.mrb[16].mxu1 }
 0x9b3   : > { %v1649_v46 = vmul.f32 0.17677669, %v1591_v43  ;;  %v3349_v47 = vpop.f32.mrb[17].mxu1 }
 0x9b4   : > { %v1594_v48 = vpop.f32.mrb[18].mxu1 }
 0x9b5   : > { %v1650_v50 = vmul.f32 0.17677669, %v1594_v48  ;;  %v3350_v51 = vpop.f32.mrb[19].mxu1  ;;  %v1653_v52 = vsel %vm1160_vm2, %v1649_v46, -inf }
 0x9b6   : > { %1654 = vmax.xlane.f32.xlu0 %v1653_v52 }
 0x9b7   : > { %v1656_v53 = vsel %vm1160_vm2, %v1650_v50, -inf }
 0x9b8   : > { %1657 = vmax.xlane.f32.xlu1 %v1656_v53 }
 0x9d5   : > { %v4784_v54 = vpop.f32.mrb[24].mxu0 }
 0x9d6   : > { %v3343_v57 = vpop.f32.mrb[25].mxu0 }
 0x9d7   : > { %v4786_v58 = vpop.f32.mrb[26].mxu0 }
 0x9d8   : > { %v3597_v59 = vpack.i.bf16 %v4786_v58, %v4784_v54  ;;  %v3344_v60 = vpop.f32.mrb[27].mxu0 }
 0x9dd   : > { %v1642_v61 = vpop.f32.mrb[28].mxu0 }
 0x9de   : > { %v1651_v62 = vmul.f32 0.17677669, %v1642_v61  ;;  %v3355_v63 = vpop.f32.mrb[29].mxu0 }
 0x9df   : > { %v1645_v0 = vpop.f32.mrb[30].mxu0 }
 0x9e0   : > { %v1652_v1 = vmul.f32 0.17677669, %v1645_v0  ;;  %v3356_v2 = vpop.f32.mrb[31].mxu0  ;;  %v1659_v3 = vsel %vm1160_vm2, %v1651_v62, -inf }
 0x9e1   : > { %1660 = vmax.xlane.f32.xlu0 %v1659_v3 }
 0x9e2   : > { %v1662_v4 = vsel %vm1160_vm2, %v1652_v1, -inf }
 0x9e5   : > { %1663 = vmax.xlane.f32.xlu0 %v1662_v4 }
 0xa43   : > { %v1655_v5 = vpop.xlane.xlu0 %1654 }
 0xa44   : > { %v1665_v6 = vsub.f32 %v1649_v46, %v1655_v5 }
 0xa45   : > { %v1658_v8 = vpop.xlane.xlu1 %1657 }
 0xa46   : > { %v1669_v9 = vmul.f32 1.442695, %v1665_v6  ;;  %v1666_v10 = vsub.f32 %v1650_v50, %v1658_v8 }
 0xa48   : > { %3734 = vpow2.f32 %v1669_v9  ;;  %v1671_v11 = vmul.f32 1.442695, %v1666_v10 }
 0xa4a   : > { %3736 = vpow2.f32 %v1671_v11 }
 0xa52   : > { %v3735_v12 = vpop.eup %3734 }
 0xa53   : > { %v1677_v13 = vsel %vm1160_vm2, %v3735_v12, 0.0 }
 0xa54   : > { %v3737_v14 = vpop.eup %3736  ;;  %1678 = vadd.xlane.f32.xlu0 %v1677_v13 }
 0xa55   : > { %v1680_v15 = vsel %vm1160_vm2, %v3737_v14, 0.0 }
 0xa56   : > { %1681 = vadd.xlane.f32.xlu1 %v1680_v15 }
 0xa67   : > { %1746 = vrot.lane.b32.xlu1 %v4705_v32, %s4177_s23 }
 0xa6b   : > { %1795 = vrot.lane.b32.xlu1 %v4656_v45, %s4178_s14 }
 0xa6e   : > { %v1661_v17 = vpop.xlane.xlu0 %1660 }
 0xa6f   : > { %v1667_v19 = vsub.f32 %v1651_v62, %v1661_v17 }
 0xa71   : > { %v1673_v20 = vmul.f32 1.442695, %v1667_v19 }
 0xa72   : > { %v1664_v21 = vpop.xlane.xlu0 %1663 }
 0xa73   : > { %3738 = vpow2.f32 %v1673_v20  ;;  %v1668_v22 = vsub.f32 %v1652_v1, %v1664_v21 }
 0xa75   : > { %v1675_v24 = vmul.f32 1.442695, %v1668_v22 }
 0xa77   : > { %3740 = vpow2.f32 %v1675_v24 }
 0xa7d   : > { %v3739_v23 = vpop.eup %3738 }
 0xa7e   : > { %v1683_v25 = vsel %vm1160_vm2, %v3739_v23, 0.0 }
 0xa7f   : > { %1684 = vadd.xlane.f32.xlu0 %v1683_v25 }
 0xa81   : > { %v3741_v26 = vpop.eup %3740 }
 0xa82   : > { %v1686_v27 = vsel %vm1160_vm2, %v3741_v26, 0.0 }
 0xa8f   : > { %1687 = vadd.xlane.f32.xlu1 %v1686_v27 }
 0xa95   : > { %1699 = vrot.lane.b32.xlu0 %v4699_v49, %s4177_s23 }
 0xa99   : > { %1793 = vrot.lane.b32.xlu0 %v4654_v44, %s4178_s14 }
 0xaa0   : > { %1846 = vrot.lane.b32.xlu1 %v4663_v56, %s4178_s14 }
 0xaa4   : > { %1844 = vrot.lane.b32.xlu1 %v4661_v55, %s4178_s14 }
 0xae1   : > { %v1679_v36 = vpop.xlane.xlu0 %1678 }
 0xae3   : > { %v1682_v45 = vpop.xlane.xlu1 %1681 }
 0xae4   : > { %3742 = vrcp.f32 %v1682_v45 }
 0xae5   : > { %3744 = vrcp.f32 %v1679_v36 }
 0xae7   : > { %v1747_v34 = vpop.permute.xlu1 %1746 }
 0xae8   : > { %3364 = vmatpush3.bf16.msra.mxu0 %v1747_v34 }
 0xae9   : > { %3375 = vmatprep.subr.bf16.mxu0 %v4174_v28 }
 0xaeb   : > { %v1796_v55 = vpop.permute.xlu1 %1795 }
 0xaec   : > { %v1801_v56 = vsel %vm1061_vm1, %v1796_v55, 0 }
 0xaee   : > { %v3743_v37 = vpop.eup %3742 }
 0xaef   : > { %v3745_v42 = vpop.eup %3744  ;;  %v1692_v43 = vmul.f32 %v3743_v37, %v3737_v14 }
 0xaf0   : > { %v1690_v46 = vmul.f32 %v3745_v42, %v3735_v12 }
 0xaf2   : > { %v1697_v47 = vpack.c.bf16 %v1692_v43, %v1690_v46 }
 0xb0c   : > { %v1685_v39 = vpop.xlane.xlu0 %1684 }
 0xb0d   : > { %3746 = vrcp.f32 %v1685_v39 }
 0xb10   : > { %v1700_v44 = vpop.permute.xlu0 %1699 }
 0xb11   : > { %3358 = vmatpush3.bf16.msra.mxu1 %v1700_v44 }
 0xb12   : > { %3369 = vmatprep.subr.bf16.mxu1 %v4174_v28 }
 0xb14   : > { %3360 = vmatmul.mubr.msk.bf16.vlgmr.msra.gmra.mrb[20].mxu1 %vm1160_vm2, %v1697_v47  ;;  %v1794_v50 = vpop.permute.xlu0 %1793 }
 0xb15   : > { %3371 = vmatprep.mubr.msk.bf16.mxu1 %vm4175_vm0, %v4174_v28 }
 0xb17   : > { %v3747_v51 = vpop.eup %3746 }
 0xb18   : > { %v1694_v53 = vmul.f32 %v3747_v51, %v3739_v23 }
 0xb1a   : > { %3370 = vmatpush3.bf16.xpose.msra.mxu1 %v1801_v56 }
 0xb1b   : > { %3381 = vmatprep.subr.bf16.mxu1 %v4174_v28 }
 0xb1c   : > { %v1688_v48 = vpop.xlane.xlu1 %1687 }
 0xb1d   : > { %3748 = vrcp.f32 %v1688_v48 }
 0xb20   : > { %v1847_v60 = vpop.permute.xlu1 %1846 }
 0xb21   : > { %3372 = vmatmul.mubr.msk.bf16.vlgmr.msra.gmra.mrb[24].mxu1 %vm1061_vm1, %v1794_v50  ;;  %v1852_v62 = vsel %vm1061_vm1, %v1847_v60, 0 }
 0xb22   : > { %3383 = vmatprep.mubr.msk.bf16.mxu1 %vm4175_vm0, %v4174_v28 }
 0xb24   : > { %v1845_v63 = vpop.permute.xlu1 %1844 }
 0xb27   : > { %v3749_v52 = vpop.eup %3748 }
 0xb28   : > { %v1696_v57 = vmul.f32 %v3749_v52, %v3741_v26 }
 0xb2a   : > { %v1698_v61 = vpack.c.bf16 %v1696_v57, %v1694_v53 }
 0xb2c   : > { %3366 = vmatmul.mubr.msk.bf16.vlgmr.msra.gmra.mrb[32].mxu0 %vm1160_vm2, %v1698_v61 }
 0xb2d   : > { %3376 = vmatpush3.bf16.xpose.msra.mxu0 %v1852_v62  ;;  %3377 = vmatprep.mubr.msk.bf16.mxu0 %vm4175_vm0, %v4174_v28 }
 0xb2e   : > { %3387 = vmatprep.subr.bf16.mxu0 %v4174_v28 }
 0xb34   : > { %3378 = vmatmul.mubr.msk.bf16.vlgmr.msra.gmra.mrb[36].mxu0 %vm1061_vm1, %v1845_v63 }
 0xb35   : > { %3389 = vmatprep.mubr.msk.bf16.mxu0 %vm4175_vm0, %v4174_v28 }
 0xbe7   : > { %v1739_v0 = vpop.f32.mrb[20].mxu1 }
 0xbe8   : > { %v3361_v1 = vpop.f32.mrb[21].mxu1 }
 0xbe9   : > { %v1742_v2 = vpop.f32.mrb[22].mxu1 }
 0xbea   : > { %v3602_v3 = vpack.i.bf16 %v1742_v2, %v1739_v0  ;;  %v3362_v4 = vpop.f32.mrb[23].mxu1 }
 0xbf4   : > { %v1837_v5 = vpop.f32.mrb[24].mxu1 }
 0xbf5   : > { %v1895_v6 = vmul.f32 0.17677669, %v1837_v5  ;;  %v3373_v8 = vpop.f32.mrb[25].mxu1 }
 0xbf6   : > { %v1840_v9 = vpop.f32.mrb[26].mxu1  ;;  %v3655_v8 = vld [vmem:[%s4596_s26 + $0x8] sm:$0xff]  }
 0xbf7   : > { %v1896_v10 = vmul.f32 0.17677669, %v1840_v9  ;;  %v3374_v11 = vpop.f32.mrb[27].mxu1  ;;  %v1899_v12 = vsel %vm1160_vm2, %v1895_v6, -inf  ;;  %v3656_v9 = vld [vmem:[%s4596_s26 + $0x10] sm:$0xff]  }
 0xbf8   : > { %1900 = vmax.xlane.f32.xlu0 %v1899_v12  ;;  %v3658_v11 = vld [vmem:[%s4596_s26 + $0x20] sm:$0xff]   ;;  %v3659_v12 = vld [vmem:[%s4596_s26 + $0x28] sm:$0xff]  }
 0xbf9   : > { %v1902_v13 = vsel %vm1160_vm2, %v1896_v10, -inf }
 0xbfa   : > { %1903 = vmax.xlane.f32.xlu1 %v1902_v13  ;;  %v3660_v13 = vld [vmem:[%s4596_s26 + $0x30] sm:$0xff]  }
 0xbff   : > { %v1786_v14 = vpop.f32.mrb[32].mxu0 }
 0xc00   : > { %v3367_v15 = vpop.f32.mrb[33].mxu0 }
 0xc01   : > { %v1789_v28 = vpop.f32.mrb[34].mxu0 }
 0xc02   : > { %v3607_v17 = vpack.i.bf16 %v1789_v28, %v1786_v14  ;;  %v3368_v19 = vpop.f32.mrb[35].mxu0 }
 0xc07   : > { %v1888_v20 = vpop.f32.mrb[36].mxu0 }
 0xc08   : > { %v1897_v21 = vmul.f32 0.17677669, %v1888_v20  ;;  %v3379_v22 = vpop.f32.mrb[37].mxu0  ;;  %v3661_v20 = vld [vmem:[%s4596_s26 + $0x38] sm:$0xff]  }
 0xc09   : > { %v1891_v23 = vpop.f32.mrb[38].mxu0 }
 0xc0a   : > { %v1898_v24 = vmul.f32 0.17677669, %v1891_v23  ;;  %v3380_v25 = vpop.f32.mrb[39].mxu0  ;;  %v1905_v26 = vsel %vm1160_vm2, %v1897_v21, -inf }
 0xc0b   : > { %1906 = vmax.xlane.f32.xlu0 %v1905_v26 }
 0xc0c   : > { %v1908_v27 = vsel %vm1160_vm2, %v1898_v24, -inf }
 0xc0f   : > { %1909 = vmax.xlane.f32.xlu0 %v1908_v27 }
 0xc85   : > { %v1901_v45 = vpop.xlane.xlu0 %1900 }
 0xc86   : > { %v1911_v34 = vsub.f32 %v1895_v6, %v1901_v45  ;;  %v3654_v6 = vld [vmem:[%s4596_s26] sm:$0xff]  }
 0xc87   : > { %v1904_v36 = vpop.xlane.xlu1 %1903 }
 0xc88   : > { %v1915_v37 = vmul.f32 1.442695, %v1911_v34  ;;  %v1912_v39 = vsub.f32 %v1896_v10, %v1904_v36  ;;  %v3657_v10 = vld [vmem:[%s4596_s26 + $0x18] sm:$0xff]  }
 0xc8a   : > { %3750 = vpow2.f32 %v1915_v37  ;;  %v1917_v42 = vmul.f32 1.442695, %v1912_v39 }
 0xc8c   : > { %3752 = vpow2.f32 %v1917_v42 }
 0xc94   : > { %v3751_v43 = vpop.eup %3750 }
 0xc95   : > { %v1923_v46 = vsel %vm1160_vm2, %v3751_v43, 0.0 }
 0xc96   : > { %v3753_v44 = vpop.eup %3752  ;;  %1924 = vadd.xlane.f32.xlu0 %v1923_v46 }
 0xc97   : > { %v1926_v47 = vsel %vm1160_vm2, %v3753_v44, 0.0 }
 0xc98   : > { %1927 = vadd.xlane.f32.xlu1 %v1926_v47  ;;  %v1907_v55 = vpop.xlane.xlu0 %1906 }
 0xc99   : > { %v1913_v56 = vsub.f32 %v1897_v21, %v1907_v55 }
 0xc9b   : > { %v1919_v48 = vmul.f32 1.442695, %v1913_v56 }
 0xc9c   : > { %v1910_v50 = vpop.xlane.xlu0 %1909 }
 0xc9d   : > { %3754 = vpow2.f32 %v1919_v48  ;;  %v1914_v51 = vsub.f32 %v1898_v24, %v1910_v50 }
 0xc9f   : > { %v1921_v52 = vmul.f32 1.442695, %v1914_v51 }
 0xca1   : > { %3756 = vpow2.f32 %v1921_v52 }
 0xca7   : > { %v3755_v53 = vpop.eup %3754 }
 0xca8   : > { %v1929_v57 = vsel %vm1160_vm2, %v3755_v53, 0.0 }
 0xca9   : > { %1930 = vadd.xlane.f32.xlu0 %v1929_v57 }
 0xcab   : > { %v3757_v60 = vpop.eup %3756 }
 0xcac   : > { %v1932_v61 = vsel %vm1160_vm2, %v3757_v60, 0.0 }
 0xcad   : > { %1933 = vadd.xlane.f32.xlu1 %v1932_v61 }
 0xcbe   : > { %1992 = vrot.lane.b32.xlu1 %v4705_v32, %s4178_s14 }
 0xcbf   : > { %1945 = vrot.lane.b32.xlu0 %v4699_v49, %s4178_s14 }
 0xcc2   : > { %3593 = vrot.lane.b32.xlu1 %v3592_v41, %s4178_s14 }
 0xcc3   : > { %3603 = vrot.lane.b32.xlu0 %v3602_v3, %s4177_s23 }
 0xcc6   : > { %3598 = vrot.lane.b32.xlu1 %v3597_v59, %s4178_s14 }
 0xcca   : > { %3608 = vrot.lane.b32.xlu1 %v3607_v17, %s4177_s23 }
 0xd23   : > { %v1925_v63 = vpop.xlane.xlu0 %1924 }
 0xd25   : > { %v1928_v62 = vpop.xlane.xlu1 %1927 }
 0xd26   : > { %3758 = vrcp.f32 %v1928_v62 }
 0xd27   : > { %3760 = vrcp.f32 %v1925_v63 }
 0xd30   : > { %v3759_v32 = vpop.eup %3758 }
 0xd31   : > { %v3761_v0 = vpop.eup %3760  ;;  %v1938_v1 = vmul.f32 %v3759_v32, %v3753_v44 }
 0xd32   : > { %v1936_v38 = vmul.f32 %v3761_v0, %v3751_v43 }
 0xd34   : > { %v1943_v54 = vpack.c.bf16 %v1938_v1, %v1936_v38 }
 0xd36   : > { %v1931_v49 = vpop.xlane.xlu0 %1930 }
 0xd37   : > { %3762 = vrcp.f32 %v1931_v49 }
 0xd3a   : > { %v1934_v40 = vpop.xlane.xlu1 %1933  ;;  %v1946_v41 = vpop.permute.xlu0 %1945 }
 0xd3b   : > { %3764 = vrcp.f32 %v1934_v40  ;;  %3382 = vmatpush3.bf16.msra.mxu1 %v1946_v41  ;;  %v2119_v41 = vld [vmem:[%s4606_s18 + $0x1] ss:$0 sm:$0xff] }
 0xd3c   : > { %3393 = vmatprep.subr.bf16.mxu1 %v3654_v6 }
 0xd3e   : > { %v1993_v58 = vpop.permute.xlu1 %1992  ;;  %3384 = vmatmul.mubr.msk.bf16.vlgmr.msra.gmra.mrb[28].mxu1 %vm1160_vm2, %v1943_v54  ;;  %v3604_v34 = vpop.permute.xlu0 %3603 }
 0xd3f   : > { %3388 = vmatpush3.bf16.msra.mxu0 %v1993_v58  ;;  %3394 = vmatpush3.bf16.msra.mxu1 %v3654_v6  ;;  %v3606_v39 = vunpack.i.h.bf16 %v3604_v34  ;;  %v3605_v42 = vunpack.i.l.bf16 %v3604_v34  ;;  %v3783_v6 = vld [vmem:[#allocation2 + $0x8] sm:$0xff] }
 0xd40   : > { %3395 = vmatprep.subr.bf16.mxu1 %v3655_v8 }
 0xd41   : > { %v3763_v59 = vpop.eup %3762 }
 0xd42   : > { %v1940_v3 = vmul.f32 %v3763_v59, %v3755_v53  ;;  %v3594_v26 = vpop.permute.xlu1 %3593 }
 0xd43   : > { %3396 = vmatpush3.bf16.msra.mxu1 %v3655_v8  ;;  %v3596_v27 = vunpack.i.h.bf16 %v3594_v26  ;;  %v3595_v45 = vunpack.i.l.bf16 %v3594_v26 }
 0xd44   : > { %3397 = vmatprep.subr.bf16.mxu1 %v3656_v9 }
 0xd45   : > { %v3765_v2 = vpop.eup %3764  ;;  %v2088_v36 = vsel %vm1061_vm1, %v4732_v18, %v3596_v27  ;;  %v2087_v37 = vsel %vm1061_vm1, %v4730_v16, %v3595_v45 }
 0xd46   : > { %v1942_v4 = vmul.f32 %v3765_v2, %v3757_v60  ;;  %v3599_v46 = vpop.permute.xlu1 %3598  ;;  %v2092_v55 = vsel %vm2091_vm3, %v2087_v37, %v3605_v42  ;;  %v2093_v56 = vsel %vm2091_vm3, %v2088_v36, %v3606_v39 }
 0xd47   : > { %3398 = vmatpush3.bf16.msra.mxu1 %v3656_v9  ;;  %v3601_v16 = vunpack.i.h.bf16 %v3599_v46  ;;  %v3600_v52 = vunpack.i.l.bf16 %v3599_v46  ;;  %v3670_v46 = vld [vmem:[%s4598_s28 + $0x24] ss:$8 sps:$4 sm:$0xff]  }
 0xd48   : > { %v1944_v5 = vpack.c.bf16 %v1942_v4, %v1940_v3  ;;  %3399 = vmatprep.subr.bf16.mxu1 %v3657_v10  ;;  %v3782_v4 = vld [vmem:[#allocation2] sm:$0xff] }
 0xd49   : > { %v2090_v61 = vsel %vm1061_vm1, %v4738_v35, %v3601_v16  ;;  %v2089_v62 = vsel %vm1061_vm1, %v4736_v29, %v3600_v52  ;;  %v3680_v16 = vld [vmem:[%s4598_s28 + $0x60] ss:$8 sps:$4 sm:$0xff]   ;;  %v3685_v52 = vld [vmem:[%s4598_s28 + $0x74] ss:$8 sps:$4 sm:$0xff]  }
 0xd4a   : > { %3390 = vmatmul.mubr.msk.bf16.vlgmr.msra.gmra.mrb[40].mxu0 %vm1160_vm2, %v1944_v5  ;;  %v3609_v51 = vpop.permute.xlu1 %3608 }
 0xd4b   : > { %2419 = vmatprep.mubr.bf16.mxu0 %v4173_v7  ;;  %3400 = vmatpush3.bf16.msra.mxu1 %v3657_v10  ;;  %v3611_v53 = vunpack.i.h.bf16 %v3609_v51  ;;  %v3610_v57 = vunpack.i.l.bf16 %v3609_v51  ;;  %v3784_v10 = vld [vmem:[#allocation2 + $0x10] sm:$0xff] }
 0xd4c   : > { %3401 = vmatprep.subr.bf16.mxu1 %v3658_v11  ;;  %v3682_v51 = vld [vmem:[%s4598_s28 + $0x64] ss:$8 sps:$4 sm:$0xff]  }
 0xd4d   : > { %v2094_v49 = vsel %vm2091_vm3, %v2089_v62, %v3610_v57  ;;  %v2095_v0 = vsel %vm2091_vm3, %v2090_v61, %v3611_v53  ;;  %v3683_v53 = vld [vmem:[%s4598_s28 + $0x70] ss:$8 sps:$4 sm:$0xff]   ;;  %v3686_v57 = vld [vmem:[%s4604_s20 + $0x40] sm:$0xff]   ;;  %v3688_v61 = vld [vmem:[%s4604_s20 + $0x48] sm:$0xff]  }
 0xd4e   : > { %v3689_v62 = vld [vmem:[%s4604_s20 + $0x8] sm:$0xff]  }
 0xd4f   : > { %3402 = vmatpush3.bf16.msra.mxu1 %v3658_v11 }
 0xd50   : > { %3403 = vmatprep.subr.bf16.mxu1 %v3659_v12 }
 0xd53   : > { %3404 = vmatpush3.bf16.msra.mxu1 %v3659_v12  ;;  %v3785_v12 = vld [vmem:[#allocation2 + $0x18] sm:$0xff] }
 0xd54   : > { %3405 = vmatprep.subr.bf16.mxu1 %v3660_v13 }
 0xd57   : > { %3406 = vmatpush3.bf16.msra.mxu1 %v3660_v13 }
 0xd58   : > { %3407 = vmatprep.subr.bf16.mxu1 %v3661_v20 }
 0xd5b   : > { %3408 = vmatpush3.bf16.msra.mxu1 %v3661_v20 }
 0xd5c   : > { %3219 = vmatprep.subr.bf16.mxu1 %v3686_v57 }
 0xe11   : > { %v1985_v14 = vpop.f32.mrb[28].mxu1 }
 0xe12   : > { %v3385_v15 = vpop.f32.mrb[29].mxu1 }
 0xe13   : > { %v1988_v28 = vpop.f32.mrb[30].mxu1  ;;  %v3664_v15 = vld [vmem:[%s4598_s28 + $0x4] ss:$8 sps:$4 sm:$0xff]  }
 0xe14   : > { %v3612_v17 = vpack.i.bf16 %v1988_v28, %v1985_v14  ;;  %v3386_v19 = vpop.f32.mrb[31].mxu1  ;;  %v3662_v14 = vld [vmem:[%s4598_s28] ss:$8 sps:$4 sm:$0xff]   ;;  %v3667_v28 = vld [vmem:[%s4598_s28 + $0x14] ss:$8 sps:$4 sm:$0xff]   ;;  %2387 = vmatprep.subr.bf16.mxu0 %v3664_v15 }
 0xe15   : > { %2388 = vmatpush1.bf16.msra.mxu0 %v3662_v14 }
 0xe16   : > { %3613 = vrot.lane.b32.xlu0 %v3612_v17, %s4176_s8  ;;  %v3665_v17 = vld [vmem:[%s4598_s28 + $0x10] ss:$8 sps:$4 sm:$0xff]   ;;  %2389 = vmatprep.subr.bf16.mxu0 %v3667_v28 }
 0xe17   : > { %v2222_v28 = vld [vmem:[%s4606_s18 + $0x3] ss:$0 sm:$0xff] }
 0xe19   : > { %2390 = vmatpush1.bf16.msra.mxu0 %v3665_v17 }
 0xe1a   : > { %2391 = vmatprep.subr.bf16.mxu0 %v3670_v46  ;;  %v3107_v46 = vld [vmem:[%s4606_s18 + $0x4] ss:$8 sm:$0x3] }
 0xe1d   : > { %v2032_v21 = vpop.f32.mrb[40].mxu0 }
 0xe1e   : > { %v3391_v22 = vpop.f32.mrb[41].mxu0 }
 0xe1f   : > { %v2035_v23 = vpop.f32.mrb[42].mxu0 }
 0xe20   : > { %v3617_v24 = vpack.i.bf16 %v2035_v23, %v2032_v21  ;;  %v3392_v25 = vpop.f32.mrb[43].mxu0 }
 0xe22   : > { %3618 = vrot.lane.b32.xlu1 %v3617_v24, %s4176_s8 }
 0xe88   : > { %v3614_v43 = vpop.permute.xlu0 %3613 }
 0xe89   : > { %v3616_v44 = vunpack.i.h.bf16 %v3614_v43  ;;  %v3615_v47 = vunpack.i.l.bf16 %v3614_v43 }
 0xe8b   : > { %v2097_v48 = vsel %vm2096_vm4, %v2092_v55, %v3615_v47  ;;  %v2098_v50 = vsel %vm2096_vm4, %v2093_v56, %v3616_v44  ;;  %v3668_v44 = vld [vmem:[%s4598_s28 + $0x20] ss:$8 sps:$4 sm:$0xff]   ;;  %v3673_v47 = vld [vmem:[%s4598_s28 + $0x34] ss:$8 sps:$4 sm:$0xff]   ;;  %v3671_v55 = vld [vmem:[%s4598_s28 + $0x30] ss:$8 sps:$4 sm:$0xff]  }
 0xe8c   : > { %v2101_v18 = vpack.c.bf16 %v2098_v50, %v2097_v48  ;;  %2392 = vmatpush1.bf16.msra.mxu0 %v3668_v44  ;;  %v3676_v56 = vld [vmem:[%s4598_s28 + $0x44] ss:$8 sps:$4 sm:$0xff]   ;;  %v3674_v48 = vld [vmem:[%s4598_s28 + $0x40] ss:$8 sps:$4 sm:$0xff]   ;;  %v3679_v50 = vld [vmem:[%s4598_s28 + $0x54] ss:$8 sps:$4 sm:$0xff]   ;;  %v2304_v44 = vrot.slane %v3107_v46, %v816_v33 }
 0xe8d   : > { %2393 = vmatprep.subr.bf16.mxu0 %v3673_v47 }
 0xe8e   : > { %3409 = vmatprep.mubr.bf16.mxu1 %v2101_v18  ;;  %v3677_v18 = vld [vmem:[%s4598_s28 + $0x50] ss:$8 sps:$4 sm:$0xff]  }
 0xe90   : > { %2394 = vmatpush1.bf16.msra.mxu0 %v3671_v55 }
 0xe91   : > { %2395 = vmatprep.subr.bf16.mxu0 %v3676_v56 }
 0xe94   : > { %v3619_v60 = vpop.permute.xlu1 %3618  ;;  %2396 = vmatpush1.bf16.msra.mxu0 %v3674_v48 }
 0xe95   : > { %v3621_v63 = vunpack.i.h.bf16 %v3619_v60  ;;  %v3620_v32 = vunpack.i.l.bf16 %v3619_v60  ;;  %2397 = vmatprep.subr.bf16.mxu0 %v3679_v50  ;;  %v3687_v60 = vld [vmem:[%s4604_s20] sm:$0xff]  }
 0xe97   : > { %v2100_v1 = vsel %vm2096_vm4, %v2095_v0, %v3621_v63  ;;  %v2099_v38 = vsel %vm2096_vm4, %v2094_v49, %v3620_v32  ;;  %v3690_v63 = vld [vmem:[%s4604_s20 + $0x50] sm:$0xff]   ;;  %v3692_v49 = vld [vmem:[%s4604_s20 + $0x58] sm:$0xff]  }
 0xe98   : > { %v2102_v40 = vpack.c.bf16 %v2100_v1, %v2099_v38  ;;  %2398 = vmatpush1.bf16.msra.mxu0 %v3677_v18  ;;  %v3691_v32 = vld [vmem:[%s4604_s20 + $0x10] sm:$0xff]   ;;  %v3693_v0 = vld [vmem:[%s4604_s20 + $0x18] sm:$0xff]   ;;  %v3694_v1 = vld [vmem:[%s4604_s20 + $0x60] sm:$0xff]  }
 0xe99   : > { %2399 = vmatprep.subr.bf16.mxu0 %v3682_v51  ;;  %v3695_v38 = vld [vmem:[%s4604_s20 + $0x20] sm:$0xff]  }
 0xe9a   : > { %3410 = vmatmul.mubr.bf16.vlgmr.msra.gmra.mrb[32].mxu1 %v2102_v40  ;;  %v3696_v40 = vld [vmem:[%s4604_s20 + $0x68] sm:$0xff]  }
 0xe9b   : > { %3220 = vmatpush3.bf16.msra.mxu1 %v3687_v60 }
 0xe9c   : > { %2400 = vmatpush1.bf16.msra.mxu0 %v3680_v16  ;;  %3221 = vmatprep.subr.bf16.mxu1 %v3688_v61 }
 0xe9d   : > { %2401 = vmatprep.subr.bf16.mxu0 %v3685_v52 }
 0xe9f   : > { %3222 = vmatpush3.bf16.msra.mxu1 %v3689_v62 }
 0xea0   : > { %2402 = vmatpush1.bf16.msra.mxu0 %v3683_v53  ;;  %3223 = vmatprep.subr.bf16.mxu1 %v3690_v63 }
 0xea3   : > { %3224 = vmatpush3.bf16.msra.mxu1 %v3691_v32 }
 0xea4   : > { %3225 = vmatprep.subr.bf16.mxu1 %v3692_v49 }
 0xea7   : > { %3226 = vmatpush3.bf16.msra.mxu1 %v3693_v0 }
 0xea8   : > { %3227 = vmatprep.subr.bf16.mxu1 %v3694_v1 }
 0xeab   : > { %3228 = vmatpush3.bf16.msra.mxu1 %v3695_v38 }
 0xeac   : > { %3229 = vmatprep.subr.bf16.mxu1 %v3696_v40 }
 0xf6d   : > { %v3411_v54 = vpop.f32.mrb[32].mxu1 }
 0xf6e   : > { %v2202_v58 = vpop.f32.mrb[33].mxu1  ;;  %v2211_v29 = vadd.f32 %v3411_v54, %v2119_v41 }
 0xf6f   : > { %v2203_v59 = vadd.f32 %v2202_v58, %v2119_v41  ;;  %v3412_v35 = vpop.f32.mrb[34].mxu1 }
 0xf70   : > { %v2205_v2 = vpop.f32.mrb[35].mxu1  ;;  %v2214_v9 = vadd.f32 %v3412_v35, %v2119_v41  ;;  %v2219_v11 = vadd.f32 %v3784_v10, %v2211_v29  ;;  %v2221_v10 = vld [vmem:[%s4606_s18 + $0x2] ss:$0 sm:$0xff] }
 0xf71   : > { %v2206_v3 = vadd.f32 %v2205_v2, %v2119_v41  ;;  %v2217_v5 = vadd.f32 %v3782_v4, %v2203_v59 }
 0xf72   : > { %v2220_v13 = vadd.f32 %v3785_v12, %v2214_v9 }
 0xf73   : > { %2223 = vadd.xlane.f32.xlu0 %v2217_v5  ;;  %v2218_v8 = vadd.f32 %v3783_v6, %v2206_v3 }
 0xf75   : > { %2225 = vadd.xlane.f32.xlu1 %v2218_v8 }
 0xf77   : > { %2227 = vadd.xlane.f32.xlu0 %v2219_v11 }
 0xf7b   : > { %2229 = vadd.xlane.f32.xlu0 %v2220_v13 }
0x1000   : > { %v2224_v19 = vpop.xlane.xlu0 %2223 }
0x1001   : > { %v2232_v20 = vmul.f32 0.0078125, %v2224_v19 }
0x1002   : > { %v2226_v21 = vpop.xlane.xlu1 %2225 }
0x1003   : > { %v4882_v22 = vsub.f32 %v2217_v5, %v2232_v20  ;;  %v2233_v23 = vmul.f32 0.0078125, %v2226_v21 }
0x1004   : > { %v2228_v24 = vpop.xlane.xlu0 %2227 }
0x1005   : > { %v4884_v25 = vsub.f32 %v2218_v8, %v2233_v23  ;;  %v2234_v26 = vmul.f32 0.0078125, %v2228_v24  ;;  %v2240_v27 = vmul.f32 %v4882_v22, %v4882_v22 }
0x1007   : > { %v4888_v45 = vsub.f32 %v2219_v11, %v2234_v26  ;;  %2244 = vadd.xlane.f32.xlu0 %v2240_v27  ;;  %v2241_v34 = vmul.f32 %v4884_v25, %v4884_v25 }
0x1008   : > { %v2230_v36 = vpop.xlane.xlu0 %2229 }
0x1009   : > { %v2235_v37 = vmul.f32 0.0078125, %v2230_v36  ;;  %2246 = vadd.xlane.f32.xlu1 %v2241_v34  ;;  %v2242_v39 = vmul.f32 %v4888_v45, %v4888_v45  ;;  %v3697_v36 = vld [vmem:[%s4604_s20 + $0x28] sm:$0xff]  }
0x100a   : > { %3230 = vmatpush3.bf16.msra.mxu1 %v3697_v36 }
0x100b   : > { %v4894_v42 = vsub.f32 %v2220_v13, %v2235_v37  ;;  %2248 = vadd.xlane.f32.xlu0 %v2242_v39  ;;  %v3698_v37 = vld [vmem:[%s4604_s20 + $0x70] sm:$0xff]  }
0x100c   : > { %v3699_v39 = vld [vmem:[%s4604_s20 + $0x30] sm:$0xff]   ;;  %3231 = vmatprep.subr.bf16.mxu1 %v3698_v37 }
0x100d   : > { %v2243_v43 = vmul.f32 %v4894_v42, %v4894_v42 }
0x100e   : > { %3232 = vmatpush3.bf16.msra.mxu1 %v3699_v39 }
0x100f   : > { %2250 = vadd.xlane.f32.xlu1 %v2243_v43  ;;  %v3701_v43 = vld [vmem:[%s4604_s20 + $0x38] sm:$0xff]  }
0x1094   : > { %v2245_v41 = vpop.xlane.xlu0 %2244 }
0x1095   : > { %v2252_v54 = vmul.f32 0.0078125, %v2245_v41 }
0x1096   : > { %v2247_v58 = vpop.xlane.xlu1 %2246 }
0x1097   : > { %v2256_v59 = vadd.f32 1e-05, %v2252_v54  ;;  %v2253_v35 = vmul.f32 0.0078125, %v2247_v58 }
0x1098   : > { %v2249_v2 = vpop.xlane.xlu0 %2248 }
0x1099   : > { %3766 = vrsqrt.f32 %v2256_v59  ;;  %v2257_v29 = vadd.f32 1e-05, %v2253_v35  ;;  %v2254_v3 = vmul.f32 0.0078125, %v2249_v2  ;;  %v2484_v2 = vld [vmem:[%s4606_s18 + $0x5] ss:$0 sm:$0xff] }
0x109b   : > { %3768 = vrsqrt.f32 %v2257_v29  ;;  %v2258_v4 = vadd.f32 1e-05, %v2254_v3 }
0x109c   : > { %v2251_v5 = vpop.xlane.xlu1 %2250 }
0x109d   : > { %3770 = vrsqrt.f32 %v2258_v4  ;;  %v2255_v6 = vmul.f32 0.0078125, %v2251_v5 }
0x109f   : > { %v2259_v8 = vadd.f32 1e-05, %v2255_v6 }
0x10a1   : > { %3772 = vrsqrt.f32 %v2259_v8 }
0x10a3   : > { %v3767_v9 = vpop.eup %3766 }
0x10a4   : > { %v2264_v11 = vmul.f32 %v3767_v9, %v4882_v22 }
0x10a5   : > { %v3769_v12 = vpop.eup %3768 }
0x10a6   : > { %v2265_v13 = vmul.f32 %v3769_v12, %v4884_v25  ;;  %v2268_v14 = vmul.f32 %v2264_v11, %v2221_v10 }
0x10a7   : > { %v3771_v15 = vpop.eup %3770 }
0x10a8   : > { %v2269_v17 = vmul.f32 %v2265_v13, %v2221_v10  ;;  %v4925_v19 = vadd.f32 %v2268_v14, %v2222_v28  ;;  %v2266_v21 = vmul.f32 %v3771_v15, %v4888_v45 }
0x10aa   : > { %v4927_v20 = vadd.f32 %v2269_v17, %v2222_v28  ;;  %v2270_v25 = vmul.f32 %v2266_v21, %v2221_v10 }
0x10ab   : > { %v3773_v23 = vpop.eup %3772 }
0x10ac   : > { %v2276_v22 = vpack.c.bf16 %v4927_v20, %v4925_v19  ;;  %v2267_v24 = vmul.f32 %v3773_v23, %v4894_v42  ;;  %v4936_v34 = vadd.f32 %v2270_v25, %v2222_v28  ;;  %v3700_v42 = vld [vmem:[%s4604_s20 + $0x78] sm:$0xff]  }
0x10ad   : > { %3233 = vmatprep.subr.bf16.mxu1 %v3700_v42 }
0x10ae   : > { %2420 = vmatmul.mubr.bf16.vlgmr.msra.gmra.mrb[44].mxu0 %v2276_v22  ;;  %v2271_v26 = vmul.f32 %v2267_v24, %v2221_v10  ;;  %3234 = vmatpush3.bf16.msra.mxu1 %v3701_v43 }
0x10af   : > { %2429 = vmatprep.mubr.bf16.mxu0 %v4173_v7  ;;  %v2300_v7 = vrot.slane %v3107_v46, %v812_v31 }
0x10b0   : > { %v4934_v27 = vadd.f32 %v2271_v26, %v2222_v28 }
0x10b2   : > { %v2277_v45 = vpack.c.bf16 %v4934_v27, %v4936_v34 }
0x10b6   : > { %2430 = vmatmul.mubr.bf16.gmra.mrb[48].mxu0 %v2277_v45 }
0x1181   : > { %v2421_v47 = vpop.f32.mrb[44].mxu0 }
0x1182   : > { %v2422_v55 = vadd.f32 %v2421_v47, %v2300_v7  ;;  %v2423_v56 = vpop.f32.mrb[45].mxu0 }
0x1183   : > { %v2424_v48 = vadd.f32 %v2423_v56, %v2304_v44  ;;  %v2425_v50 = vpop.f32.mrb[46].mxu0 }
0x1184   : > { %v2426_v18 = vadd.f32 %v2425_v50, %v2300_v7  ;;  %v2427_v51 = vpop.f32.mrb[47].mxu0  ;;  %v2440_v52 = vmax.f32 %v2422_v55, 0.0 }
0x1185   : > { %v2428_v16 = vadd.f32 %v2427_v51, %v2304_v44  ;;  %v2441_v57 = vmax.f32 %v2424_v48, 0.0 }
0x1186   : > { %v2442_v53 = vmax.f32 %v2426_v18, 0.0 }
0x1187   : > { %v2443_v60 = vmax.f32 %v2428_v16, 0.0 }
0x1188   : > { %v2448_v61 = vpack.c.bf16 %v2442_v53, %v2440_v52 }
0x1189   : > { %v2449_v62 = vpack.c.bf16 %v2443_v60, %v2441_v57  ;;  %v2431_v63 = vpop.f32.mrb[48].mxu0 }
0x118a   : > { %v2432_v32 = vadd.f32 %v2431_v63, %v2300_v7  ;;  %v2433_v31 = vpop.f32.mrb[49].mxu0  ;;  %v2634_v63 = vld [vmem:[%s4606_s18 + $0x6] ss:$0 sm:$0xff] }
0x118b   : > { %v2434_v49 = vadd.f32 %v2433_v31, %v2304_v44  ;;  %v2435_v30 = vpop.f32.mrb[50].mxu0  ;;  %2613 = vmatprep.mubr.bf16.mxu1 %v2449_v62 }
0x118c   : > { %v2436_v33 = vadd.f32 %v2435_v30, %v2300_v7  ;;  %v2437_v0 = vpop.f32.mrb[51].mxu0  ;;  %2614 = vmatmul.mubr.bf16.vlgmr.msra.gmra.mrb[36].mxu1 %v2448_v61  ;;  %v2444_v38 = vmax.f32 %v2432_v32, 0.0 }
0x118d   : > { %v2438_v1 = vadd.f32 %v2437_v0, %v2304_v44  ;;  %v2445_v41 = vmax.f32 %v2434_v49, 0.0  ;;  %v2635_v49 = vld [vmem:[%s4606_s18 + $0x7] ss:$0 sm:$0xff] }
0x118e   : > { %v2446_v40 = vmax.f32 %v2436_v33, 0.0 }
0x118f   : > { %v2447_v54 = vmax.f32 %v2438_v1, 0.0 }
0x1190   : > { %v2450_v58 = vpack.c.bf16 %v2446_v40, %v2444_v38 }
0x1191   : > { %v2451_v59 = vpack.c.bf16 %v2447_v54, %v2445_v41 }
0x1193   : > { %2621 = vmatprep.mubr.bf16.mxu1 %v2451_v59 }
0x1194   : > { %2622 = vmatmul.mubr.bf16.gmra.mrb[40].mxu1 %v2450_v58 }
0x125f   : > { %v3235_v35 = vpop.f32.mrb[36].mxu1 }
0x1260   : > { %v3236_v29 = vpop.f32.mrb[37].mxu1 }
0x1261   : > { %v3237_v3 = vadd.f32 %v3236_v29, %v3235_v35  ;;  %v3238_v4 = vpop.f32.mrb[38].mxu1 }
0x1262   : > { %v3239_v5 = vpop.f32.mrb[39].mxu1 }
0x1263   : > { %v2616_v6 = vadd.f32 %v3237_v3, %v2484_v2  ;;  %v3240_v8 = vadd.f32 %v3239_v5, %v3238_v4  ;;  %v3786_v3 = vld [vmem:[#allocation17] sm:$0xff] (!%p3140_p8)   ;;  %v3787_v5 = vld [vmem:[#allocation17 + $0x8] sm:$0xff] (!%p3140_p8)  }
0x1264   : > { %3413 = vmatprep.subr.bf16.mxu0 (!%p3140_p8), %v3786_v3 }
0x1265   : > { %v2619_v9 = vadd.f32 %v3240_v8, %v2484_v2  ;;  %v2630_v10 = vadd.f32 %v2616_v6, %v4925_v19  ;;  %3414 = vmatpush3.bf16.msra.mxu0 (!%p3140_p8), %v3786_v3  ;;  %v3788_v6 = vld [vmem:[#allocation17 + $0x10] sm:$0xff] (!%p3140_p8)   ;;  %v3789_v8 = vld [vmem:[#allocation17 + $0x18] sm:$0xff] (!%p3140_p8)  }
0x1266   : > { %3415 = vmatprep.subr.bf16.mxu0 (!%p3140_p8), %v3787_v5 }
0x1267   : > { %v3241_v11 = vpop.f32.mrb[40].mxu1  ;;  %2636 = vadd.xlane.f32.xlu0 %v2630_v10  ;;  %v2631_v12 = vadd.f32 %v2619_v9, %v4927_v20  ;;  %v3790_v9 = vld [vmem:[#allocation17 + $0x20] sm:$0xff] (!%p3140_p8)  }
0x1268   : > { %v3242_v13 = vpop.f32.mrb[41].mxu1 }
0x1269   : > { %v3243_v14 = vadd.f32 %v3242_v13, %v3241_v11  ;;  %v3244_v15 = vpop.f32.mrb[42].mxu1  ;;  %2638 = vadd.xlane.f32.xlu1 %v2631_v12  ;;  %3416 = vmatpush3.bf16.msra.mxu0 (!%p3140_p8), %v3787_v5  ;;  %v3792_v11 = vld [vmem:[#allocation17 + $0x30] sm:$0xff] (!%p3140_p8)  }
0x126a   : > { %v3245_v28 = vpop.f32.mrb[43].mxu1  ;;  %3417 = vmatprep.subr.bf16.mxu0 (!%p3140_p8), %v3788_v6 }
0x126b   : > { %v2624_v17 = vadd.f32 %v3243_v14, %v2484_v2  ;;  %v3246_v21 = vadd.f32 %v3245_v28, %v3244_v15  ;;  %v3141_v14 = vld [vmem:[#allocation6 + $0x3] ss:$0 sm:$0xff] (!%p3140_p8) }
0x126d   : > { %v2627_v23 = vadd.f32 %v3246_v21, %v2484_v2  ;;  %v2632_v22 = vadd.f32 %v2624_v17, %v4936_v34  ;;  %3418 = vmatpush3.bf16.msra.mxu0 (!%p3140_p8), %v3788_v6 }
0x126e   : > { %3419 = vmatprep.subr.bf16.mxu0 (!%p3140_p8), %v3789_v8 }
0x126f   : > { %2640 = vadd.xlane.f32.xlu0 %v2632_v22  ;;  %v2633_v24 = vadd.f32 %v2627_v23, %v4934_v27 }
0x1271   : > { %2642 = vadd.xlane.f32.xlu1 %v2633_v24  ;;  %3420 = vmatpush3.bf16.msra.mxu0 (!%p3140_p8), %v3789_v8 }
0x1272   : > { %3421 = vmatprep.subr.bf16.mxu0 (!%p3140_p8), %v3790_v9 }
0x1275   : > { %3422 = vmatpush3.bf16.msra.mxu0 (!%p3140_p8), %v3790_v9 }
0x12f4   : > { %v2637_v25 = vpop.xlane.xlu0 %2636 }
0x12f5   : > { %v2644_v19 = vmul.f32 0.0078125, %v2637_v25 }
0x12f6   : > { %v2639_v26 = vpop.xlane.xlu1 %2638 }
0x12f7   : > { %v2648_v45 = vsub.f32 %v2630_v10, %v2644_v19  ;;  %v2645_v36 = vmul.f32 0.0078125, %v2639_v26  ;;  %v3791_v10 = vld [vmem:[#allocation17 + $0x28] sm:$0xff] (!%p3140_p8)  }
0x12f8   : > { %3423 = vmatprep.subr.bf16.mxu0 (!%p3140_p8), %v3791_v10 }
0x12f9   : > { %v2649_v20 = vsub.f32 %v2631_v12, %v2645_v36  ;;  %v2652_v37 = vmul.f32 %v2648_v45, %v2648_v45  ;;  %3424 = vmatpush3.bf16.msra.mxu0 (!%p3140_p8), %v3791_v10  ;;  %v3793_v12 = vld [vmem:[#allocation17 + $0x38] sm:$0xff] (!%p3140_p8)  }
0x12fa   : > { %3425 = vmatprep.subr.bf16.mxu0 (!%p3140_p8), %v3792_v11 }
0x12fb   : > { %2656 = vadd.xlane.f32.xlu0 %v2652_v37  ;;  %v2653_v39 = vmul.f32 %v2649_v20, %v2649_v20 }
0x12fc   : > { %v2641_v42 = vpop.xlane.xlu0 %2640 }
0x12fd   : > { %v2646_v43 = vmul.f32 0.0078125, %v2641_v42  ;;  %2658 = vadd.xlane.f32.xlu1 %v2653_v39  ;;  %3426 = vmatpush3.bf16.msra.mxu0 (!%p3140_p8), %v3792_v11 }
0x12fe   : > { %v2643_v46 = vpop.xlane.xlu1 %2642  ;;  %3427 = vmatprep.subr.bf16.mxu0 (!%p3140_p8), %v3793_v12 }
0x12ff   : > { %v2650_v7 = vsub.f32 %v2632_v22, %v2646_v43  ;;  %v2647_v44 = vmul.f32 0.0078125, %v2643_v46 }
0x1301   : > { %v2651_v34 = vsub.f32 %v2633_v24, %v2647_v44  ;;  %v2654_v47 = vmul.f32 %v2650_v7, %v2650_v7  ;;  %3428 = vmatpush3.bf16.msra.mxu0 (!%p3140_p8), %v3793_v12 }
0x1303   : > { %2660 = vadd.xlane.f32.xlu0 %v2654_v47  ;;  %v2655_v27 = vmul.f32 %v2651_v34, %v2651_v34 }
0x1305   : > { %2662 = vadd.xlane.f32.xlu1 %v2655_v27 }
0x1388   : > { %v2657_v55 = vpop.xlane.xlu0 %2656 }
0x1389   : > { %v2664_v56 = vmul.f32 0.0078125, %v2657_v55 }
0x138a   : > { %v2659_v48 = vpop.xlane.xlu1 %2658 }
0x138b   : > { %v2668_v50 = vadd.f32 1e-05, %v2664_v56  ;;  %v2665_v18 = vmul.f32 0.0078125, %v2659_v48 }
0x138d   : > { %3774 = vrsqrt.f32 %v2668_v50  ;;  %v2669_v51 = vadd.f32 1e-05, %v2665_v18 }
0x138f   : > { %3776 = vrsqrt.f32 %v2669_v51 }
0x1390   : > { %v2661_v16 = vpop.xlane.xlu0 %2660 }
0x1391   : > { %v2666_v52 = vmul.f32 0.0078125, %v2661_v16 }
0x1392   : > { %v2663_v53 = vpop.xlane.xlu1 %2662 }
0x1393   : > { %v2670_v57 = vadd.f32 1e-05, %v2666_v52  ;;  %v2667_v60 = vmul.f32 0.0078125, %v2663_v53 }
0x1395   : > { %3778 = vrsqrt.f32 %v2670_v57  ;;  %v2671_v61 = vadd.f32 1e-05, %v2667_v60 }
0x1397   : > { %v3775_v62 = vpop.eup %3774  ;;  %3780 = vrsqrt.f32 %v2671_v61 }
0x1398   : > { %v2676_v32 = vmul.f32 %v3775_v62, %v2648_v45 }
0x1399   : > { %v3777_v31 = vpop.eup %3776 }
0x139a   : > { %v2680_v30 = vmul.f32 %v2676_v32, %v2634_v63  ;;  %v2677_v33 = vmul.f32 %v3777_v31, %v2649_v20 }
0x139c   : > { %v2684_v0 = vadd.f32 %v2680_v30, %v2635_v49  ;;  %v2681_v1 = vmul.f32 %v2677_v33, %v2634_v63 }
0x139e   : > { %2688 = vst [vmem:[#allocation2] sm:$0xff] %v2684_v0  ;;  %v2685_v38 = vadd.f32 %v2681_v1, %v2635_v49 }
0x139f   : > { %v3779_v40 = vpop.eup %3778 }
0x13a0   : > { %2689 = vst [vmem:[#allocation2 + $0x8] sm:$0xff] %v2685_v38  ;;  %v2678_v41 = vmul.f32 %v3779_v40, %v2650_v7  ;;  %v2696_v4 = vpack.c.bf16 (!%p3140_p8), %v2685_v38, %v2684_v0 }
0x13a1   : > { %v3781_v54 = vpop.eup %3780 }
0x13a2   : > { %v2682_v58 = vmul.f32 %v2678_v41, %v2634_v63  ;;  %v2679_v59 = vmul.f32 %v3781_v54, %v2651_v34  ;;  %2695 = sbr.rel (%p3140_p8) target bundleno = 5252 (0x1484), region = 100  ;;  %3429 = vmatprep.mubr.bf16.mxu0 (!%p3140_p8), %v2696_v4 }
0x13a4   : > { %v2686_v35 = vadd.f32 %v2682_v58, %v2635_v49  ;;  %v2683_v2 = vmul.f32 %v2679_v59, %v2634_v63 }
0x13a6   : > { %2690 = vst [vmem:[#allocation2 + $0x10] sm:$0xff] %v2686_v35  ;;  %v2687_v29 = vadd.f32 %v2683_v2, %v2635_v49 }
0x13a8   : > { %2691 = vst [vmem:[#allocation2 + $0x18] sm:$0xff] %v2687_v29  ;;  %v2697_v13 = vpack.c.bf16 (!%p3140_p8), %v2687_v29, %v2686_v35 }
0x13aa   : > { %3430 = vmatmul.mubr.bf16.vlgmr.msra.gmra.mrb[0].mxu0 %v2697_v13 }
0x147d   : > { %v3431_v15 = vpop.f32.mrb[0].mxu0 }
0x147e   : > { %v2810_v28 = vadd.f32 %v3431_v15, %v3141_v14  ;;  %v2801_v17 = vpop.f32.mrb[1].mxu0 }
0x147f   : > { %v2802_v21 = vadd.f32 %v3141_v14, %v2801_v17  ;;  %v3432_v23 = vpop.f32.mrb[2].mxu0 }
0x1480   : > { %2818 = vst [vmem:[#allocation18 + $0x10] sm:$0xff] %v2810_v28  ;;  %v2813_v22 = vadd.f32 %v3432_v23, %v3141_v14  ;;  %v2804_v24 = vpop.f32.mrb[3].mxu0 }
0x1481   : > { %2816 = vst [vmem:[#allocation18] sm:$0xff] %v2802_v21  ;;  %v2805_v25 = vadd.f32 %v3141_v14, %v2804_v24 }
0x1482   : > { %2819 = vst [vmem:[#allocation18 + $0x18] sm:$0xff] %v2813_v22 }
0x1483   : > { %2817 = vst [vmem:[#allocation18 + $0x8] sm:$0xff] %v2805_v25 }
0x1484 PF: > { %s5082_s16 = sld [smem:[#allocation30_spill]]  ;;  %s4179_s22 = smov [#allocation18]  }
0x1485   : > { %s2829_s15 = sshll.u32 %s4179_s22, 4  ;;  %s2830_s15 = int_to_ptr.vmem [resolvable:$true] %s2829_s15 }
0x1486   : > { %s4056_s21 = scalar_lea.vmem %s2830_s15, 512  ;;  %p4063_p9 = scmp.lt.s32.totalorder %s2830_s15, %s2830_s15 }
0x1487   : > { %p4057_p7 = scmp.ne.s32.totalorder %s2830_s15, %s4056_s21  ;;  %p4064_p0 = scmp.lt.s32.totalorder %s4056_s21, %s4056_s21 }
0x1489   : > { %p4065_p4 = por %p4064_p0, %p4063_p9 }
0x148a   : > { %p3507_p2 = scmp.eq.s32.totalorder %s5082_s16, 1 }
0x148c   : > { %p4058_p1 = pnand %p4057_p7, %p3507_p2 }
0x148e   : > { %p4059_p10 = pneg %p4058_p1 }
0x1490   : > { %p4066_p12 = pnand %p4065_p4, %p4059_p10 }
0x1492   : > { %4069 = shalt.err (!%p4066_p12)
}
0x1493   : > { %s5083_s3 = sld [smem:[#allocation38_spill]] }
0x1499   : > { %s4070_s11 = scalar_lea.hbm %s5083_s3, 512 }
0x149a   : > { %p4071_p3 = scmp.ne.s32.totalorder %s5083_s3, %s4070_s11  ;;  %p4076_p13 = scmp.lt.u32.totalorder %s4070_s11, %s5083_s3 }
0x149c   : > { %p4072_p5 = pnand %p4071_p3, %p3507_p2 }
0x149e   : > { %p4073_p11 = pneg %p4072_p5 }
0x14a0   : > { %p4078_p6 = pnand %p4076_p13, %p4073_p11 }
0x14a2   : > { %4081 = shalt.err (!%p4078_p6)
}
0x14a3   : > { %s4180_s30 = smov 128   ;;  %s4181_s26 = smov 8  }
0x14a4   : > { %3466 = dma.vmem_to_hbm [thread:$0]  (%p3507_p2), %s2830_s15, 512, %s5083_s3, [#allocation5], %s4180_s30, %s4180_s30, %s4181_s26  }
0x14a5   : > { %4131 = dma.done.wait (%p3507_p2), [#allocation5], 512  }
0x14a6   : > { %4133 = vsyncadd (%p3507_p2), [#allocation5], 4294966784 }
0x14a7 PF: > { %s5084_s9 = sld [smem:[#allocation29_spill]]  ;;  %s5085_s30 = sld [smem:[#allocation26_spill]] }
0x14a8   : > { %s5086_s10 = sld [smem:[#allocation27_spill]]  ;;  %s5087_s11 = sld [smem:[#allocation33_spill]] }
0x14a9   : > { %s5088_s20 = sld [smem:[#allocation32_spill]]  ;;  %s5089_s12 = smov %s4152_s13 }
0x14ad   : > { %s31_s14 = sadd.s32 1, %s5084_s9  }
0x14ae   : > { %p28_p8 = scmp.ge.s32.totalorder %s31_s14, 4  }
0x14af   : > { %s5090_s13 = smov %s5088_s20 }
0x14b0   :  { %30 = sbr.rel (!%p28_p8) target bundleno = 17 (0x11), region = 169 }
0x14b7   :  { %2845 = vsyncpa [#allocation4], 1 }
0x14b8   :  { %2847 = vsyncpa [#allocation4 + $0x1], 1 }
0x14b9   :  { %2848 = vsyncpa [#allocation7], 1 }
0x14ba   :  { %2849 = vsyncpa [#allocation10], 1 }
0x14bb   :  { %2851 = vsyncpa [#allocation10 + $0x1], 1 }
0x14bc   :  { %2852 = vsyncpa [#allocation13], 1 }
0x14bd   :  { %2854 = vsyncpa [#allocation13 + $0x1], 1 }
0x14be   :  { %2855 = vsyncpa [#allocation16], 1 }
0x14bf   :  { %2857 = vsyncpa [#allocation16 + $0x1], 1 }
0x14c0   :  { %2858 = vsyncpa [#allocation5], 1 }
0x14c1   :  { %2860 = vsyncpa [#allocation5 + $0x1], 1 }

</bundles_post_ra>
